<compile_context>
chip_gen: v7x
topology: tpu7x:2x2x1
jax: 0.10.0
libtpu: 0.0.40
codegen_flags: <defaults>
</compile_context>

<pallas_src>
import functools

import jax
import jax.numpy as jnp
from jax import lax
from jax.experimental import pallas as pl
from jax.experimental.pallas import tpu as pltpu


def _round_up(v, m):
    return (v + m - 1) // m * m


def _fused_conv_kernel(x_ref, w_ref, b_ref, o_ref, *, KH, KW, stride):
    """One (batch element, Cout-tile) step of the fused conv.

    x_ref: (1, Hp, Wp, Cin)       bf16/f32  padded NHWC input image
    w_ref: (KH*KW, Cin, tile_n)   bf16/f32  equalized-lr-scaled weights
    b_ref: (1, tile_n)            f32       bias (zero-padded)
    o_ref: (1, Ho*Wo, tile_n)     f32       NHWC-flat output tile
    """
    _, Hp, Wp, Cin = x_ref.shape
    _, M, tile_n = o_ref.shape
    Ho = (Hp - KH) // stride + 1
    Wo = (Wp - KW) // stride + 1

    acc = jnp.zeros((M, tile_n), jnp.float32)
    # Fused im2col: KH*KW shifted windows, each a (Ho*Wo, Cin) @ (Cin, tile_n)
    # MXU matmul accumulated in f32 (static unrolled loop; KH*KW is small).
    for kh in range(KH):
        for kw in range(KW):
            if stride == 1:
                win = x_ref[0, kh:kh + Ho, kw:kw + Wo, :]
            else:
                win = x_ref[0,
                            pl.ds(kh, Ho, stride=stride),
                            pl.ds(kw, Wo, stride=stride), :]
            patch = win.reshape(Ho * Wo, Cin)
            acc = acc + jnp.dot(patch, w_ref[kh * KW + kw],
                                preferred_element_type=jnp.float32)
    o_ref[0] = (acc + b_ref[...]).astype(o_ref.dtype)


def conv2d_forward(x, weight, bias, *, stride, padding, gain=1.0,
                   compute_dtype=jnp.bfloat16):
    """Equalized-lr Conv2d forward: conv2d(x, weight * c, bias, stride, padding).

    x:      (N, Cin, H, W)      f32 (NCHW, PyTorch layout)
    weight: (Cout, Cin, KH, KW) f32
    bias:   (Cout,)             f32
    returns (N, Cout, Ho, Wo)   f32
    """
    N, Cin, H, W = x.shape
    Cout, _, KH, KW = weight.shape
    s, p = int(stride), int(padding)
    Ho = (H + 2 * p - KH) // s + 1
    Wo = (W + 2 * p - KW) // s + 1
    Hp, Wp = H + 2 * p, W + 2 * p

    # Equalized learning-rate constant: c = sqrt(2 / (k*k*Cin)) * gain.
    c = jnp.sqrt(jnp.asarray(2.0 / (KH * KW * Cin), jnp.float32)) * jnp.float32(gain)

    cout_pad = _round_up(Cout, 128)            # lane-dense output / weight N dim
    tile_n = 256 if cout_pad % 256 == 0 else 128

    # NCHW -> NHWC + spatial zero pad; bf16 operand stream (f32 accum in-kernel).
    x_nhwc = jnp.pad(x.transpose(0, 2, 3, 1),
                     ((0, 0), (p, p), (p, p), (0, 0))).astype(compute_dtype)

    # (Cout, Cin, KH, KW) -> (KH*KW, Cin, Cout_pad), scaled by c, (kh, kw)-major.
    w = (weight * c).transpose(2, 3, 1, 0).reshape(KH * KW, Cin, Cout)
    w = jnp.pad(w, ((0, 0), (0, 0), (0, cout_pad - Cout))).astype(compute_dtype)
    b = jnp.pad(bias.astype(jnp.float32), (0, cout_pad - Cout)).reshape(1, cout_pad)

    kernel = functools.partial(_fused_conv_kernel, KH=KH, KW=KW, stride=s)

    # TODO(synk): row-band the H axis (input band with a KH-1 halo via manual
    # make_async_copy double-buffering) when one padded image no longer fits
    # the VMEM budget (very large resolutions / Cin, esp. v7x's 64 MiB).
    out = pl.pallas_call(
        kernel,
        out_shape=jax.ShapeDtypeStruct((N, Ho * Wo, cout_pad), jnp.float32),
        grid=(N, cout_pad // tile_n),
        in_specs=[
            pl.BlockSpec((1, Hp, Wp, Cin), lambda n, j: (n, 0, 0, 0)),
            pl.BlockSpec((KH * KW, Cin, tile_n), lambda n, j: (0, 0, j)),
            pl.BlockSpec((1, tile_n), lambda n, j: (0, j)),
        ],
        out_specs=pl.BlockSpec((1, Ho * Wo, tile_n), lambda n, j: (n, 0, j)),
        compiler_params=pltpu.CompilerParams(
            dimension_semantics=("parallel", "parallel")),
    )(x_nhwc, w, b)

    # Drop the Cout padding and return NCHW like the PyTorch module.
    y = out[:, :, :Cout].reshape(N, Ho, Wo, Cout).transpose(0, 3, 1, 2)
    return y


if __name__ == "__main__":
    # Module config: Conv2d(kernel_size, stride, padding, in_channels, out_channels)
    kernel_size, stride, padding = 3, 1, 1
    in_channels, out_channels, gain = 4, 8, 1.0
    batch, spatial = 2, 16

    key = jax.random.PRNGKey(0)
    k_w, k_x = jax.random.split(key)

    # Deterministic parameter init mirroring the PyTorch module:
    #   weight ~ N(0, 1), bias = 0
    weight = jax.random.normal(
        k_w, (out_channels, in_channels, kernel_size, kernel_size), dtype=jnp.float32)
    bias = jnp.zeros((out_channels,), dtype=jnp.float32)
    x = jax.random.normal(
        k_x, (batch, in_channels, spatial, spatial), dtype=jnp.float32)

    conv = jax.jit(functools.partial(
        conv2d_forward, stride=stride, padding=padding, gain=gain))
    y = jax.block_until_ready(conv(x, weight, bias))

    # Reference: XLA f32 conv with the same equalized-lr scaling + bias.
    c = jnp.sqrt(jnp.asarray(2.0 / (kernel_size * kernel_size * in_channels),
                             jnp.float32)) * jnp.float32(gain)
    y_ref = lax.conv_general_dilated(
        x, weight * c,
        window_strides=(stride, stride),
        padding=[(padding, padding), (padding, padding)],
        dimension_numbers=("NCHW", "OIHW", "NCHW"),
    ) + bias.reshape(1, out_channels, 1, 1)

    assert y.shape == (batch, out_channels, spatial, spatial)
    # bf16 operand stream + f32 accumulation -> loose tolerance vs f32 reference.
    assert jnp.allclose(y, y_ref, atol=5e-2, rtol=5e-2), float(
        jnp.max(jnp.abs(y - y_ref)))
    print("KERNEL_OK")
</pallas_src>

<mosaic_0001>
module attributes {stable_mosaic.version = 11 : i64} {
  func.func @_fused_conv_kernel(%arg0: i32, %arg1: i32, %arg2: memref<1x18x18x4xbf16, #tpu.memory_space<vmem>>, %arg3: memref<9x4x128xbf16, #tpu.memory_space<vmem>>, %arg4: memref<1x128xf32, #tpu.memory_space<vmem>>, %arg5: memref<1x256x128xf32, #tpu.memory_space<vmem>>) attributes {dimension_semantics = [#tpu.dimension_semantics<parallel>, #tpu.dimension_semantics<parallel>], iteration_bounds = array<i64: 2, 1>, scalar_prefetch = 0 : i64, scratch_operands = 0 : i64, tpu.core_type = #tpu.core_type<tc>, window_params = [{transform_indices = @transform_0, window_bounds = array<i64: 1, 18, 18, 4>}, {transform_indices = @transform_1, window_bounds = array<i64: 9, 4, 128>}, {transform_indices = @transform_2, window_bounds = array<i64: 1, 128>}, {transform_indices = @transform_3, window_bounds = array<i64: 1, 256, 128>}]} {
    %cst = arith.constant 0.000000e+00 : f32
    %0 = vector.broadcast %cst : f32 to vector<256x128xf32>
    %c0 = arith.constant 0 : index
    %c0_0 = arith.constant 0 : index
    %c0_1 = arith.constant 0 : index
    %c0_2 = arith.constant 0 : index
    %1 = vector.load %arg2[%c0, %c0_0, %c0_1, %c0_2] : memref<1x18x18x4xbf16, #tpu.memory_space<vmem>>, vector<1x16x16x4xbf16>
    %2 = vector.shape_cast %1 : vector<1x16x16x4xbf16> to vector<16x16x4xbf16>
    %3 = vector.shape_cast %2 : vector<16x16x4xbf16> to vector<256x4xbf16>
    %c0_3 = arith.constant 0 : index
    %c0_4 = arith.constant 0 : index
    %c0_5 = arith.constant 0 : index
    %4 = vector.load %arg3[%c0_3, %c0_4, %c0_5] : memref<9x4x128xbf16, #tpu.memory_space<vmem>>, vector<1x4x128xbf16>
    %5 = vector.shape_cast %4 : vector<1x4x128xbf16> to vector<4x128xbf16>
    %cst_6 = arith.constant dense<0.000000e+00> : vector<256x128xf32>
    %6 = tpu.matmul %3, %5, %cst_6 {dimension_numbers = #tpu.dot_dimension_numbers<[1], [0], [0], [1], [0, 0, 1, 1], [], []>} : vector<256x4xbf16>, vector<4x128xbf16>, vector<256x128xf32> -> vector<256x128xf32>
    %7 = arith.addf %0, %6 : vector<256x128xf32>
    %c0_7 = arith.constant 0 : index
    %c0_8 = arith.constant 0 : index
    %c1 = arith.constant 1 : index
    %c0_9 = arith.constant 0 : index
    %8 = vector.load %arg2[%c0_7, %c0_8, %c1, %c0_9] : memref<1x18x18x4xbf16, #tpu.memory_space<vmem>>, vector<1x16x16x4xbf16>
    %9 = vector.shape_cast %8 : vector<1x16x16x4xbf16> to vector<16x16x4xbf16>
    %10 = vector.shape_cast %9 : vector<16x16x4xbf16> to vector<256x4xbf16>
    %c1_10 = arith.constant 1 : index
    %c0_11 = arith.constant 0 : index
    %c0_12 = arith.constant 0 : index
    %11 = vector.load %arg3[%c1_10, %c0_11, %c0_12] : memref<9x4x128xbf16, #tpu.memory_space<vmem>>, vector<1x4x128xbf16>
    %12 = vector.shape_cast %11 : vector<1x4x128xbf16> to vector<4x128xbf16>
    %cst_13 = arith.constant dense<0.000000e+00> : vector<256x128xf32>
    %13 = tpu.matmul %10, %12, %cst_13 {dimension_numbers = #tpu.dot_dimension_numbers<[1], [0], [0], [1], [0, 0, 1, 1], [], []>} : vector<256x4xbf16>, vector<4x128xbf16>, vector<256x128xf32> -> vector<256x128xf32>
    %14 = arith.addf %7, %13 : vector<256x128xf32>
    %c0_14 = arith.constant 0 : index
    %c0_15 = arith.constant 0 : index
    %c2 = arith.constant 2 : index
    %c0_16 = arith.constant 0 : index
    %15 = vector.load %arg2[%c0_14, %c0_15, %c2, %c0_16] : memref<1x18x18x4xbf16, #tpu.memory_space<vmem>>, vector<1x16x16x4xbf16>
    %16 = vector.shape_cast %15 : vector<1x16x16x4xbf16> to vector<16x16x4xbf16>
    %17 = vector.shape_cast %16 : vector<16x16x4xbf16> to vector<256x4xbf16>
    %c2_17 = arith.constant 2 : index
    %c0_18 = arith.constant 0 : index
    %c0_19 = arith.constant 0 : index
    %18 = vector.load %arg3[%c2_17, %c0_18, %c0_19] : memref<9x4x128xbf16, #tpu.memory_space<vmem>>, vector<1x4x128xbf16>
    %19 = vector.shape_cast %18 : vector<1x4x128xbf16> to vector<4x128xbf16>
    %cst_20 = arith.constant dense<0.000000e+00> : vector<256x128xf32>
    %20 = tpu.matmul %17, %19, %cst_20 {dimension_numbers = #tpu.dot_dimension_numbers<[1], [0], [0], [1], [0, 0, 1, 1], [], []>} : vector<256x4xbf16>, vector<4x128xbf16>, vector<256x128xf32> -> vector<256x128xf32>
    %21 = arith.addf %14, %20 : vector<256x128xf32>
    %c0_21 = arith.constant 0 : index
    %c1_22 = arith.constant 1 : index
    %c0_23 = arith.constant 0 : index
    %c0_24 = arith.constant 0 : index
    %22 = vector.load %arg2[%c0_21, %c1_22, %c0_23, %c0_24] : memref<1x18x18x4xbf16, #tpu.memory_space<vmem>>, vector<1x16x16x4xbf16>
    %23 = vector.shape_cast %22 : vector<1x16x16x4xbf16> to vector<16x16x4xbf16>
    %24 = vector.shape_cast %23 : vector<16x16x4xbf16> to vector<256x4xbf16>
    %c3 = arith.constant 3 : index
    %c0_25 = arith.constant 0 : index
    %c0_26 = arith.constant 0 : index
    %25 = vector.load %arg3[%c3, %c0_25, %c0_26] : memref<9x4x128xbf16, #tpu.memory_space<vmem>>, vector<1x4x128xbf16>
    %26 = vector.shape_cast %25 : vector<1x4x128xbf16> to vector<4x128xbf16>
    %cst_27 = arith.constant dense<0.000000e+00> : vector<256x128xf32>
    %27 = tpu.matmul %24, %26, %cst_27 {dimension_numbers = #tpu.dot_dimension_numbers<[1], [0], [0], [1], [0, 0, 1, 1], [], []>} : vector<256x4xbf16>, vector<4x128xbf16>, vector<256x128xf32> -> vector<256x128xf32>
    %28 = arith.addf %21, %27 : vector<256x128xf32>
    %c0_28 = arith.constant 0 : index
    %c1_29 = arith.constant 1 : index
    %c1_30 = arith.constant 1 : index
    %c0_31 = arith.constant 0 : index
    %29 = vector.load %arg2[%c0_28, %c1_29, %c1_30, %c0_31] : memref<1x18x18x4xbf16, #tpu.memory_space<vmem>>, vector<1x16x16x4xbf16>
    %30 = vector.shape_cast %29 : vector<1x16x16x4xbf16> to vector<16x16x4xbf16>
    %31 = vector.shape_cast %30 : vector<16x16x4xbf16> to vector<256x4xbf16>
    %c4 = arith.constant 4 : index
    %c0_32 = arith.constant 0 : index
    %c0_33 = arith.constant 0 : index
    %32 = vector.load %arg3[%c4, %c0_32, %c0_33] : memref<9x4x128xbf16, #tpu.memory_space<vmem>>, vector<1x4x128xbf16>
    %33 = vector.shape_cast %32 : vector<1x4x128xbf16> to vector<4x128xbf16>
    %cst_34 = arith.constant dense<0.000000e+00> : vector<256x128xf32>
    %34 = tpu.matmul %31, %33, %cst_34 {dimension_numbers = #tpu.dot_dimension_numbers<[1], [0], [0], [1], [0, 0, 1, 1], [], []>} : vector<256x4xbf16>, vector<4x128xbf16>, vector<256x128xf32> -> vector<256x128xf32>
    %35 = arith.addf %28, %34 : vector<256x128xf32>
    %c0_35 = arith.constant 0 : index
    %c1_36 = arith.constant 1 : index
    %c2_37 = arith.constant 2 : index
    %c0_38 = arith.constant 0 : index
    %36 = vector.load %arg2[%c0_35, %c1_36, %c2_37, %c0_38] : memref<1x18x18x4xbf16, #tpu.memory_space<vmem>>, vector<1x16x16x4xbf16>
    %37 = vector.shape_cast %36 : vector<1x16x16x4xbf16> to vector<16x16x4xbf16>
    %38 = vector.shape_cast %37 : vector<16x16x4xbf16> to vector<256x4xbf16>
    %c5 = arith.constant 5 : index
    %c0_39 = arith.constant 0 : index
    %c0_40 = arith.constant 0 : index
    %39 = vector.load %arg3[%c5, %c0_39, %c0_40] : memref<9x4x128xbf16, #tpu.memory_space<vmem>>, vector<1x4x128xbf16>
    %40 = vector.shape_cast %39 : vector<1x4x128xbf16> to vector<4x128xbf16>
    %cst_41 = arith.constant dense<0.000000e+00> : vector<256x128xf32>
    %41 = tpu.matmul %38, %40, %cst_41 {dimension_numbers = #tpu.dot_dimension_numbers<[1], [0], [0], [1], [0, 0, 1, 1], [], []>} : vector<256x4xbf16>, vector<4x128xbf16>, vector<256x128xf32> -> vector<256x128xf32>
    %42 = arith.addf %35, %41 : vector<256x128xf32>
    %c0_42 = arith.constant 0 : index
    %c2_43 = arith.constant 2 : index
    %c0_44 = arith.constant 0 : index
    %c0_45 = arith.constant 0 : index
    %43 = vector.load %arg2[%c0_42, %c2_43, %c0_44, %c0_45] : memref<1x18x18x4xbf16, #tpu.memory_space<vmem>>, vector<1x16x16x4xbf16>
    %44 = vector.shape_cast %43 : vector<1x16x16x4xbf16> to vector<16x16x4xbf16>
    %45 = vector.shape_cast %44 : vector<16x16x4xbf16> to vector<256x4xbf16>
    %c6 = arith.constant 6 : index
    %c0_46 = arith.constant 0 : index
    %c0_47 = arith.constant 0 : index
    %46 = vector.load %arg3[%c6, %c0_46, %c0_47] : memref<9x4x128xbf16, #tpu.memory_space<vmem>>, vector<1x4x128xbf16>
    %47 = vector.shape_cast %46 : vector<1x4x128xbf16> to vector<4x128xbf16>
    %cst_48 = arith.constant dense<0.000000e+00> : vector<256x128xf32>
    %48 = tpu.matmul %45, %47, %cst_48 {dimension_numbers = #tpu.dot_dimension_numbers<[1], [0], [0], [1], [0, 0, 1, 1], [], []>} : vector<256x4xbf16>, vector<4x128xbf16>, vector<256x128xf32> -> vector<256x128xf32>
    %49 = arith.addf %42, %48 : vector<256x128xf32>
    %c0_49 = arith.constant 0 : index
    %c2_50 = arith.constant 2 : index
    %c1_51 = arith.constant 1 : index
    %c0_52 = arith.constant 0 : index
    %50 = vector.load %arg2[%c0_49, %c2_50, %c1_51, %c0_52] : memref<1x18x18x4xbf16, #tpu.memory_space<vmem>>, vector<1x16x16x4xbf16>
    %51 = vector.shape_cast %50 : vector<1x16x16x4xbf16> to vector<16x16x4xbf16>
    %52 = vector.shape_cast %51 : vector<16x16x4xbf16> to vector<256x4xbf16>
    %c7 = arith.constant 7 : index
    %c0_53 = arith.constant 0 : index
    %c0_54 = arith.constant 0 : index
    %53 = vector.load %arg3[%c7, %c0_53, %c0_54] : memref<9x4x128xbf16, #tpu.memory_space<vmem>>, vector<1x4x128xbf16>
    %54 = vector.shape_cast %53 : vector<1x4x128xbf16> to vector<4x128xbf16>
    %cst_55 = arith.constant dense<0.000000e+00> : vector<256x128xf32>
    %55 = tpu.matmul %52, %54, %cst_55 {dimension_numbers = #tpu.dot_dimension_numbers<[1], [0], [0], [1], [0, 0, 1, 1], [], []>} : vector<256x4xbf16>, vector<4x128xbf16>, vector<256x128xf32> -> vector<256x128xf32>
    %56 = arith.addf %49, %55 : vector<256x128xf32>
    %c0_56 = arith.constant 0 : index
    %c2_57 = arith.constant 2 : index
    %c2_58 = arith.constant 2 : index
    %c0_59 = arith.constant 0 : index
    %57 = vector.load %arg2[%c0_56, %c2_57, %c2_58, %c0_59] : memref<1x18x18x4xbf16, #tpu.memory_space<vmem>>, vector<1x16x16x4xbf16>
    %58 = vector.shape_cast %57 : vector<1x16x16x4xbf16> to vector<16x16x4xbf16>
    %59 = vector.shape_cast %58 : vector<16x16x4xbf16> to vector<256x4xbf16>
    %c8 = arith.constant 8 : index
    %c0_60 = arith.constant 0 : index
    %c0_61 = arith.constant 0 : index
    %60 = vector.load %arg3[%c8, %c0_60, %c0_61] : memref<9x4x128xbf16, #tpu.memory_space<vmem>>, vector<1x4x128xbf16>
    %61 = vector.shape_cast %60 : vector<1x4x128xbf16> to vector<4x128xbf16>
    %cst_62 = arith.constant dense<0.000000e+00> : vector<256x128xf32>
    %62 = tpu.matmul %59, %61, %cst_62 {dimension_numbers = #tpu.dot_dimension_numbers<[1], [0], [0], [1], [0, 0, 1, 1], [], []>} : vector<256x4xbf16>, vector<4x128xbf16>, vector<256x128xf32> -> vector<256x128xf32>
    %63 = arith.addf %56, %62 : vector<256x128xf32>
    %c0_63 = arith.constant 0 : index
    %c0_64 = arith.constant 0 : index
    %64 = vector.load %arg4[%c0_63, %c0_64] : memref<1x128xf32, #tpu.memory_space<vmem>>, vector<1x128xf32>
    %65 = vector.broadcast %64 : vector<1x128xf32> to vector<256x128xf32>
    %66 = arith.addf %63, %65 : vector<256x128xf32>
    %c0_65 = arith.constant 0 : index
    %c0_66 = arith.constant 0 : index
    %c0_67 = arith.constant 0 : index
    %67 = vector.load %arg5[%c0_65, %c0_66, %c0_67] : memref<1x256x128xf32, #tpu.memory_space<vmem>>, vector<1x256x128xf32>
    %68 = vector.shape_cast %67 : vector<1x256x128xf32> to vector<256x128xf32>
    %69 = vector.shape_cast %66 : vector<256x128xf32> to vector<1x256x128xf32>
    tpu.vector_store %arg5[%c0_65, %c0_66, %c0_67], %69 {strides = array<i32>} : memref<1x256x128xf32, #tpu.memory_space<vmem>>, vector<1x256x128xf32>,
    return
  }
  func.func @transform_0(%arg0: i32, %arg1: i32) -> (i32, i32, i32, i32) {
    %c0_i32 = arith.constant 0 : i32
    %c0_i32_0 = arith.constant 0 : i32
    %c0_i32_1 = arith.constant 0 : i32
    %c0_i32_2 = arith.constant 0 : i32
    return %arg0, %c0_i32, %c0_i32_0, %c0_i32_1 : i32, i32, i32, i32
  }
  func.func @transform_1(%arg0: i32, %arg1: i32) -> (i32, i32, i32) {
    %c0_i32 = arith.constant 0 : i32
    %c0_i32_0 = arith.constant 0 : i32
    %c0_i32_1 = arith.constant 0 : i32
    return %c0_i32, %c0_i32_0, %arg1 : i32, i32, i32
  }
  func.func @transform_2(%arg0: i32, %arg1: i32) -> (i32, i32) {
    %c0_i32 = arith.constant 0 : i32
    %c0_i32_0 = arith.constant 0 : i32
    return %c0_i32, %arg1 : i32, i32
  }
  func.func @transform_3(%arg0: i32, %arg1: i32) -> (i32, i32, i32) {
    %c0_i32 = arith.constant 0 : i32
    %c0_i32_0 = arith.constant 0 : i32
    return %arg0, %c0_i32, %arg1 : i32, i32, i32
  }
}

</mosaic_0001>

<bundles_post_ra>
// kernel: conv2d_forward.1
= control target key start
LH: loop header
LB: loop body
LE: loop exit
PB: predicated region body
PF: predicated region fallthrough
CT: control target
= control target key end

     0   :  { %s6409_s12 = smov 0   ;;  %s6411_s13 = smov 0   ;;  %s8214_s0 = inlined_call_operand.vmem [shape: bf16[2,18,18,4], index: 0, kind: input, shape index: {}]   ;;  %s8215_s1 = inlined_call_operand.vmem [shape: bf16[9,4,128], index: 1, kind: input, shape index: {}]   ;;  %s8216_s2 = inlined_call_operand.vmem [shape: f32[1,128], index: 2, kind: input, shape index: {}]   ;;  %s8217_s3 = inlined_call_operand.vmem [shape: f32[2,256,128], index: 3, kind: output, shape index: {}]  }
   0x1   :  { %s6413_s14 = smov 0  }
   0x2 LB: > { %s25_s15 = sadd.s32 1, %s6383_s13  ;;  %p4964_p0 = scmp.ge.s32.totalorder %s6387_s14, 1  ;;  %s6387_s14 = sphi %s6413_s14, %s13_s14   ;;  %s6383_s13 = sphi %s6411_s13, %s8286_s13   ;;  %s6379_s12 = sphi %s6409_s12, %s8285_s12  }
   0x3   : > { %p27_p1 = scmp.ge.s32.totalorder %s25_s15, 2  ;;  %p168_p2 = scmp.lt.s32.totalorder %s6387_s14, 3 }
   0x5   : > { %s8288_s15 = smov (%p27_p1, %s25_s15), 0  ;;  %p169_p3 = pnand %p4964_p0, %p168_p2 }
   0x7   : > { %172 = sbr.rel (%p169_p3) target bundleno = 586 (0x24a), region = 32 }
   0xe   : > { %v4968_v0 = vld [vmem:[%s8215_s1 + $0x2] sm:$0x3]  ;;  %vm758_vm0 = vcmask 1041408   ;;  %v5195_v1 = vld [vmem:[%s8215_s1 + $0x8] sm:$0x3]  ;;  %p202_p4 = scmp.lt.s32.totalorder %s6379_s12, 1 }
   0xf   : > { %6225 = vmatprep.subr.msk.bf16.mxu1 %vm758_vm0, %v4968_v0  ;;  %6229 = vmatprep.subr.msk.bf16.mxu0 %vm758_vm0, %v5195_v1  ;;  %v760_v2 = vsel %vm758_vm0, %v4968_v0, 0  ;;  %v6437_v3 = vsel %vm758_vm0, %v5195_v1, 0  ;;  %v255_v4 = vld [vmem:[%s8215_s1] sm:$0x3]  ;;  %v5260_v5 = vld [vmem:[%s8215_s1 + $0xa] sm:$0x3] }
  0x10   : > { %8231 = vst [vmem:[#allocation2_spill] sm:$0xff] %v6437_v3  ;;  %5662 = vmatpush3.bf16.msra.mxu1 %v760_v2  ;;  %5798 = vmatpush3.bf16.msra.mxu0 %v6437_v3  ;;  %s8290_s12 = smov (!%p202_p4, %s6379_s12), 1  ;;  %vm272_vm1 = vsmask.f32 3328  ;;  %vm273_vm2 = vsmask.f32 7440 }
  0x11   : > { %6226 = vmatprep.subr.msk.bf16.mxu1 %vm758_vm0, %v255_v4  ;;  %6231 = vmatprep.subr.msk.bf16.mxu0 %vm758_vm0, %v5260_v5  ;;  %s6235_s24 = smul.u32 216, %s8290_s12  ;;  %vm709_vm3 = vcmask 31744   ;;  %v6467_v17 = vsel %vm758_vm0, %v255_v4, 0  ;;  %v6473_v26 = vld [vmem:[%s8215_s1 + $0xc] sm:$0x3]  ;;  %vm6480_vm4 = vmor %vm272_vm1, %vm273_vm2  ;;  %v6486_v37 = vsel %vm758_vm0, %v5260_v5, 0 }
  0x12   : > { %v6490_v41 = vsel %vm758_vm0, %v6473_v26, 0  ;;  %vm1263_vm5 = vcmask 1042432   ;;  %vm1264_vm6 = vcmask 1046532   ;;  %s5507_s19 = sshll.u32 %s8290_s12, 8 }
  0x13   : > { %s6454_s27 = scalar_lea.vmem %s8214_s0, %s6235_s24  ;;  %vm6706_vm7 = vmor %vm1263_vm5, %vm1264_vm6  ;;  %s8139_s24 = scalar_lea.vmem %s8217_s3, %s5507_s19 }
  0x14   : > { %v223_v6 = vld [vmem:[%s6454_s27] sm:$0xf]  ;;  %v224_v7 = vld [vmem:[%s6454_s27 + $0x4] sm:$0xf]  ;;  %v256_v8 = vld [vmem:[%s6454_s27 + $0x8] sm:$0x1] }
  0x15   : > { %v276_v9 = vshrl.u32 %v223_v6, 16  ;;  %v279_v10 = vshll.u32 %v223_v6, 16  ;;  %v285_v11 = vshll.u32 %v224_v7, 16  ;;  %v289_v12 = vshrl.u32 %v224_v7, 16  ;;  %v5147_v13 = vld [vmem:[%s6454_s27 + $0xc] sm:$0xf] }
  0x16   : > { %v295_v14 = vshll.u32 %v256_v8, 16  ;;  %v6461_v15 = vld [vmem:[%s6454_s27 + $0x10] sm:$0xf]  ;;  %v6464_v16 = vld [vmem:[%s6454_s27 + $0x14] sm:$0x1]  ;;  %v2080_v23 = vshrl.u32 %v5147_v13, 16 }
  0x17   : > { %v278_v18 = vrot.slane %v276_v9, 4  ;;  %v281_v19 = vrot.slane %v279_v10, 5  ;;  %v287_v20 = vrot.slane %v285_v11, 5  ;;  %v291_v21 = vrot.slane %v289_v12, 4  ;;  %v225_v31 = vld [vmem:[%s6454_s27 + $0xc] sm:$0xf] }
  0x18   : > { %v297_v22 = vrot.slane %v295_v14, 5  ;;  %v2083_v24 = vshll.u32 %v5147_v13, 16  ;;  %v2089_v25 = vshll.u32 %v6461_v15, 16  ;;  %v2093_v29 = vshrl.u32 %v6461_v15, 16  ;;  %v226_v36 = vld [vmem:[%s6454_s27 + $0x10] sm:$0xf] }
  0x19   : > { %v282_v27 = vor.u32 %v281_v19, %v278_v18  ;;  %v292_v28 = vor.u32 %v291_v21, %v287_v20  ;;  %v2099_v30 = vshll.u32 %v6464_v16, 16  ;;  %v2082_v33 = vrot.slane %v2080_v23, 4  ;;  %v257_v44 = vld [vmem:[%s6454_s27 + $0x14] sm:$0x1]  ;;  %v5150_v55 = vld [vmem:[%s6454_s27 + $0x18] sm:$0xf] }
  0x1a   : > { %v2085_v34 = vrot.slane %v2083_v24, 5  ;;  %v2091_v35 = vrot.slane %v2089_v25, 5  ;;  %v2095_v40 = vrot.slane %v2093_v29, 4  ;;  %v300_v45 = vshrl.u32 %v225_v31, 16  ;;  %v6499_v60 = vld [vmem:[%s6454_s27 + $0x1c] sm:$0xf] }
  0x1b   : > { %v283_v38 = vrot.slane %v282_v27, 4  ;;  %v293_v39 = vrot.slane %v292_v28, 4  ;;  %v2101_v43 = vrot.slane %v2099_v30, 5  ;;  %v303_v46 = vshll.u32 %v225_v31, 16  ;;  %v6507_v1 = vld [vmem:[%s6454_s27 + $0x20] sm:$0x1] }
  0x1c   : > { %v2086_v42 = vor.u32 %v2085_v34, %v2082_v33  ;;  %v2096_v49 = vor.u32 %v2095_v40, %v2091_v35  ;;  %v309_v50 = vshll.u32 %v226_v36, 16  ;;  %v302_v53 = vrot.slane %v300_v45, 4  ;;  %v227_v18 = vld [vmem:[%s6454_s27 + $0x18] sm:$0xf]  ;;  %v228_v23 = vld [vmem:[%s6454_s27 + $0x1c] sm:$0xf] }
  0x1d   : > { %v288_v47 = vsel %vm6480_vm4, %v283_v38, %v287_v20  ;;  %v298_v48 = vsel %vm6480_vm4, %v293_v39, %v297_v22  ;;  %v305_v54 = vrot.slane %v303_v46, 5  ;;  %v313_v58 = vshrl.u32 %v226_v36, 16  ;;  %v258_v31 = vld [vmem:[%s6454_s27 + $0x20] sm:$0x1]  ;;  %v5153_v40 = vld [vmem:[%s6454_s27 + $0x24] sm:$0xf] }
  0x1e   : > { %v4969_v51 = vcombine.low %v288_v47, %v298_v48  ;;  %v2087_v52 = vrot.slane %v2086_v42, 4  ;;  %v2097_v56 = vrot.slane %v2096_v49, 4  ;;  %v311_v57 = vrot.slane %v309_v50, 5  ;;  %v6530_v46 = vld [vmem:[%s6454_s27 + $0x28] sm:$0xf] }
  0x1f   : > { %v319_v59 = vshll.u32 %v257_v44, 16  ;;  %v2823_v62 = vrot.slane %v6461_v15, 5  ;;  %v2826_v63 = vrot.slane %v6464_v16, 5  ;;  %v306_v0 = vor.u32 %v305_v54, %v302_v53  ;;  %v6539_v54 = vld [vmem:[%s6454_s27 + $0x2c] sm:$0x1] }
  0x20   : > { %5663 = vmatprep.mubr.msk.bf16.mxu1 %vm709_vm3, %v4969_v51  ;;  %v2092_v61 = vsel %vm6480_vm4, %v2087_v52, %v2091_v35  ;;  %v2102_v2 = vsel %vm6480_vm4, %v2097_v56, %v2101_v43  ;;  %v315_v4 = vrot.slane %v313_v58, 4  ;;  %v2104_v6 = vshrl.u32 %v5150_v55, 16  ;;  %v5049_v51 = vld [vmem:[%s8215_s1 + $0x4] sm:$0x3]  ;;  %v6739_v16 = vld [vmem:[%s6454_s27 + $0x7c] sm:$0xf] }
  0x21   : > { %v321_v5 = vrot.slane %v319_v59, 5  ;;  %v5196_v7 = vcombine.low %v2092_v61, %v2102_v2  ;;  %v307_v8 = vrot.slane %v306_v0, 4  ;;  %v2107_v9 = vshll.u32 %v5150_v55, 16  ;;  %v229_v0 = vld [vmem:[%s6454_s27 + $0x24] sm:$0xf] }
  0x22   : > { %v2113_v10 = vshll.u32 %v6499_v60, 16  ;;  %v316_v11 = vor.u32 %v315_v4, %v311_v57  ;;  %v2106_v12 = vrot.slane %v2104_v6, 4  ;;  %v2117_v13 = vshrl.u32 %v6499_v60, 16 }
  0x23   : > { %v2123_v14 = vshll.u32 %v6507_v1, 16  ;;  %5799 = vmatprep.mubr.msk.bf16.mxu0 %vm709_vm3, %v5196_v7  ;;  %v312_v19 = vsel %vm6480_vm4, %v307_v8, %v311_v57  ;;  %v2109_v20 = vrot.slane %v2107_v9, 5  ;;  %v2830_v22 = vrot.slane %v6499_v60, 5  ;;  %v230_v7 = vld [vmem:[%s6454_s27 + $0x28] sm:$0xf] }
  0x24   : > { %v2115_v21 = vrot.slane %v2113_v10, 5  ;;  %v317_v24 = vrot.slane %v316_v11, 4  ;;  %v2119_v25 = vrot.slane %v2117_v13, 4  ;;  %v2833_v28 = vrot.slane %v6507_v1, 5  ;;  %v259_v13 = vld [vmem:[%s6454_s27 + $0x2c] sm:$0x1] }
  0x25   : > { %v2125_v27 = vrot.slane %v2123_v14, 5  ;;  %v2110_v29 = vor.u32 %v2109_v20, %v2106_v12  ;;  %v6523_v30 = vrot.slane %v2830_v22, 4  ;;  %v324_v33 = vshrl.u32 %v227_v18, 16 }
  0x26   : > { %v327_v34 = vshll.u32 %v227_v18, 16  ;;  %v322_v35 = vsel %vm6480_vm4, %v317_v24, %v321_v5  ;;  %v2120_v36 = vor.u32 %v2119_v25, %v2115_v21  ;;  %v333_v38 = vshll.u32 %v228_v23, 16  ;;  %v5156_v24 = vld [vmem:[%s6454_s27 + $0x30] sm:$0xf] }
  0x27   : > { %v337_v39 = vshrl.u32 %v228_v23, 16  ;;  %v4970_v42 = vcombine.low %v312_v19, %v322_v35  ;;  %v2111_v43 = vrot.slane %v2110_v29, 4  ;;  %v326_v44 = vrot.slane %v324_v33, 4  ;;  %v6559_v33 = vld [vmem:[%s6454_s27 + $0x34] sm:$0xf] }
  0x28   : > { %v329_v45 = vrot.slane %v327_v34, 5  ;;  %v2121_v47 = vrot.slane %v2120_v36, 4  ;;  %v335_v48 = vrot.slane %v333_v38, 5  ;;  %v343_v50 = vshll.u32 %v258_v31, 16 }
  0x29   : > { %v339_v49 = vrot.slane %v337_v39, 4  ;;  %5664 = vmatmul.mubr.msk.bf16.vlgmr.msra.gmra.mrb[0].mxu1 %vm709_vm3, %v4970_v42  ;;  %v2116_v52 = vsel %vm6480_vm4, %v2111_v43, %v2115_v21  ;;  %v2128_v55 = vshrl.u32 %v5153_v40, 16  ;;  %v2131_v56 = vshll.u32 %v5153_v40, 16  ;;  %v6567_v40 = vld [vmem:[%s6454_s27 + $0x38] sm:$0x1] }
  0x2a   : > { %v330_v53 = vor.u32 %v329_v45, %v326_v44  ;;  %5696 = vmatpush3.bf16.msra.mxu1 %v6467_v17  ;;  %v2126_v57 = vsel %vm6480_vm4, %v2121_v47, %v2125_v27  ;;  %v345_v59 = vrot.slane %v343_v50, 5  ;;  %v2137_v61 = vshll.u32 %v6530_v46, 16 }
  0x2b   : > { %v340_v58 = vor.u32 %v339_v49, %v335_v48  ;;  %v5197_v2 = vcombine.low %v2116_v52, %v2126_v57  ;;  %v2130_v5 = vrot.slane %v2128_v55, 4  ;;  %v2133_v6 = vrot.slane %v2131_v56, 5  ;;  %6227 = vmatprep.subr.msk.bf16.mxu1 %vm758_vm0, %v5049_v51  ;;  %v231_v52 = vld [vmem:[%s6454_s27 + $0x30] sm:$0xf] }
  0x2c   : > { %v331_v4 = vrot.slane %v330_v53, 4  ;;  %v2139_v9 = vrot.slane %v2137_v61, 5  ;;  %v2141_v17 = vshrl.u32 %v6530_v46, 16  ;;  %v2147_v10 = vshll.u32 %v6539_v54, 16 }
  0x2d   : > { %v341_v8 = vrot.slane %v340_v58, 4  ;;  %5800 = vmatmul.mubr.msk.bf16.vlgmr.msra.gmra.mrb[0].mxu0 %vm709_vm3, %v5197_v2  ;;  %v2134_v12 = vor.u32 %v2133_v6, %v2130_v5  ;;  %v348_v14 = vshrl.u32 %v229_v0, 16  ;;  %v351_v18 = vshll.u32 %v229_v0, 16  ;;  %v232_v58 = vld [vmem:[%s6454_s27 + $0x34] sm:$0xf] }
  0x2e   : > { %v336_v11 = vsel %vm6480_vm4, %v331_v4, %v335_v48  ;;  %5832 = vmatpush3.bf16.msra.mxu0 %v6486_v37  ;;  %v2143_v20 = vrot.slane %v2141_v17, 4  ;;  %v2149_v21 = vrot.slane %v2147_v10, 5  ;;  %v357_v23 = vshll.u32 %v230_v7, 16  ;;  %v260_v4 = vld [vmem:[%s6454_s27 + $0x38] sm:$0x1] }
  0x2f   : > { %v346_v19 = vsel %vm6480_vm4, %v341_v8, %v345_v59  ;;  %v2135_v27 = vrot.slane %v2134_v12, 4  ;;  %v350_v29 = vrot.slane %v348_v14, 4  ;;  %v353_v31 = vrot.slane %v351_v18, 5  ;;  %6232 = vmatprep.subr.msk.bf16.mxu0 %vm758_vm0, %v6473_v26  ;;  %v5159_v12 = vld [vmem:[%s6454_s27 + $0x3c] sm:$0xf] }
  0x30   : > { %v4971_v25 = vcombine.low %v336_v11, %v346_v19  ;;  %v2144_v34 = vor.u32 %v2143_v20, %v2139_v9  ;;  %v359_v35 = vrot.slane %v357_v23, 5  ;;  %v361_v37 = vshrl.u32 %v230_v7, 16  ;;  %v6584_v20 = vld [vmem:[%s6454_s27 + $0x40] sm:$0xf] }
  0x31   : > { %v367_v36 = vshll.u32 %v259_v13, 16  ;;  %v2140_v38 = vsel %vm6480_vm4, %v2135_v27, %v2139_v9  ;;  %v354_v39 = vor.u32 %v353_v31, %v350_v29  ;;  %v2152_v42 = vshrl.u32 %v5156_v24, 16 }
  0x32   : > { %5667 = vmatprep.mubr.msk.bf16.mxu1 %vm709_vm3, %v4971_v25  ;;  %v2155_v43 = vshll.u32 %v5156_v24, 16  ;;  %v2145_v44 = vrot.slane %v2144_v34, 4  ;;  %v363_v45 = vrot.slane %v361_v37, 4  ;;  %v2161_v26 = vshll.u32 %v6559_v33, 16  ;;  %v6589_v34 = vld [vmem:[%s6454_s27 + $0x44] sm:$0x1] }
  0x33   : > { %v369_v47 = vrot.slane %v367_v36, 5  ;;  %v355_v48 = vrot.slane %v354_v39, 4  ;;  %v2154_v49 = vrot.slane %v2152_v42, 4  ;;  %v2165_v51 = vshrl.u32 %v6559_v33, 16  ;;  %v233_v42 = vld [vmem:[%s6454_s27 + $0x3c] sm:$0xf] }
  0x34   : > { %v2157_v50 = vrot.slane %v2155_v43, 5  ;;  %v2150_v53 = vsel %vm6480_vm4, %v2145_v44, %v2149_v21  ;;  %v364_v55 = vor.u32 %v363_v45, %v359_v35  ;;  %v2163_v56 = vrot.slane %v2161_v26, 5  ;;  %v234_v26 = vld [vmem:[%s6454_s27 + $0x40] sm:$0xf] }
  0x35   : > { %v2171_v57 = vshll.u32 %v6567_v40, 16  ;;  %v5198_v59 = vcombine.low %v2140_v38, %v2150_v53  ;;  %v360_v61 = vsel %vm6480_vm4, %v355_v48, %v359_v35  ;;  %v2167_v2 = vrot.slane %v2165_v51, 4 }
  0x36   : > { %v2158_v0 = vor.u32 %v2157_v50, %v2154_v49  ;;  %v365_v5 = vrot.slane %v364_v55, 4  ;;  %v372_v7 = vshrl.u32 %v231_v52, 16  ;;  %v375_v8 = vshll.u32 %v231_v52, 16 }
  0x37   : > { %v2173_v6 = vrot.slane %v2171_v57, 5  ;;  %5803 = vmatprep.mubr.msk.bf16.mxu0 %vm709_vm3, %v5198_v59  ;;  %v2168_v17 = vor.u32 %v2167_v2, %v2163_v56  ;;  %v381_v10 = vshll.u32 %v232_v58, 16  ;;  %v385_v11 = vshrl.u32 %v232_v58, 16  ;;  %v5162_v2 = vld [vmem:[%s6454_s27 + $0x48] sm:$0xf] }
  0x38   : > { %v2159_v9 = vrot.slane %v2158_v0, 4  ;;  %v370_v13 = vsel %vm6480_vm4, %v365_v5, %v369_v47  ;;  %v374_v14 = vrot.slane %v372_v7, 4  ;;  %v377_v18 = vrot.slane %v375_v8, 5  ;;  %v6607_v8 = vld [vmem:[%s6454_s27 + $0x4c] sm:$0xf] }
  0x39   : > { %v391_v19 = vshll.u32 %v260_v4, 16  ;;  %v4972_v21 = vcombine.low %v360_v61, %v370_v13  ;;  %v2169_v24 = vrot.slane %v2168_v17, 4  ;;  %v383_v25 = vrot.slane %v381_v10, 5  ;;  %v261_v61 = vld [vmem:[%s6454_s27 + $0x44] sm:$0x1] }
  0x3a   : > { %v2164_v23 = vsel %vm6480_vm4, %v2159_v9, %v2163_v56  ;;  %v378_v27 = vor.u32 %v377_v18, %v374_v14  ;;  %v387_v29 = vrot.slane %v385_v11, 4  ;;  %v2176_v35 = vshrl.u32 %v5159_v12, 16 }
  0x3b   : > { %v393_v31 = vrot.slane %v391_v19, 5  ;;  %5668 = vmatmul.mubr.msk.bf16.gmra.mrb[4].mxu1 %vm709_vm3, %v4972_v21  ;;  %v2174_v37 = vsel %vm6480_vm4, %v2169_v24, %v2173_v6  ;;  %v2179_v36 = vshll.u32 %v5159_v12, 16  ;;  %v2185_v38 = vshll.u32 %v6584_v20, 16 }
  0x3c   : > { %v2189_v39 = vshrl.u32 %v6584_v20, 16  ;;  %v5199_v43 = vcombine.low %v2164_v23, %v2174_v37  ;;  %v379_v44 = vrot.slane %v378_v27, 4  ;;  %v388_v45 = vor.u32 %v387_v29, %v383_v25  ;;  %v6615_v23 = vld [vmem:[%s6454_s27 + $0x50] sm:$0x1]  ;;  %v6619_v27 = vld [vmem:[%s6454_s27 + $0x48] sm:$0xf] }
  0x3d   : > { %v2178_v47 = vrot.slane %v2176_v35, 4  ;;  %v2181_v48 = vrot.slane %v2179_v36, 5  ;;  %v2187_v49 = vrot.slane %v2185_v38, 5  ;;  %v2195_v51 = vshll.u32 %v6589_v34, 16  ;;  %v6622_v36 = vld [vmem:[%s6454_s27 + $0x4c] sm:$0xf] }
  0x3e   : > { %v2191_v50 = vrot.slane %v2189_v39, 4  ;;  %5804 = vmatmul.mubr.msk.bf16.gmra.mrb[4].mxu0 %vm709_vm3, %v5199_v43  ;;  %v384_v52 = vsel %vm6480_vm4, %v379_v44, %v383_v25  ;;  %v389_v53 = vrot.slane %v388_v45, 4  ;;  %v396_v55 = vshrl.u32 %v233_v42, 16 }
  0x3f   : > { %v399_v56 = vshll.u32 %v233_v42, 16  ;;  %v2182_v57 = vor.u32 %v2181_v48, %v2178_v47  ;;  %v2197_v59 = vrot.slane %v2195_v51, 5  ;;  %v405_v0 = vshll.u32 %v234_v26, 16 }
  0x40   : > { %v2192_v58 = vor.u32 %v2191_v50, %v2187_v49  ;;  %v394_v4 = vsel %vm6480_vm4, %v389_v53, %v393_v31  ;;  %v398_v5 = vrot.slane %v396_v55, 4  ;;  %v409_v7 = vshrl.u32 %v234_v26, 16  ;;  %v262_v26 = vld [vmem:[%s6454_s27 + $0x50] sm:$0x1]  ;;  %v5165_v53 = vld [vmem:[%s6454_s27 + $0x54] sm:$0xf] }
  0x41   : > { %v401_v6 = vrot.slane %v399_v56, 5  ;;  %v4973_v9 = vcombine.low %v384_v52, %v394_v4  ;;  %v2183_v17 = vrot.slane %v2182_v57, 4  ;;  %v407_v11 = vrot.slane %v405_v0, 5  ;;  %v6638_v4 = vld [vmem:[%s6454_s27 + $0x58] sm:$0xf] }
  0x42   : > { %v2193_v10 = vrot.slane %v2192_v58, 4  ;;  %v411_v13 = vrot.slane %v409_v7, 4  ;;  %v415_v14 = vshll.u32 %v261_v61, 16  ;;  %v2200_v18 = vshrl.u32 %v5162_v2, 16 }
  0x43   : > { %v402_v12 = vor.u32 %v401_v6, %v398_v5  ;;  %5671 = vmatprep.mubr.msk.bf16.mxu1 %vm709_vm3, %v4973_v9  ;;  %v2188_v19 = vsel %vm6480_vm4, %v2183_v17, %v2187_v49  ;;  %v2203_v24 = vshll.u32 %v5162_v2, 16  ;;  %v2209_v25 = vshll.u32 %v6607_v8, 16 }
  0x44   : > { %v2198_v21 = vsel %vm6480_vm4, %v2193_v10, %v2197_v59  ;;  %v412_v35 = vor.u32 %v411_v13, %v407_v11  ;;  %v417_v37 = vrot.slane %v415_v14, 5  ;;  %v2202_v38 = vrot.slane %v2200_v18, 4 }
  0x45   : > { %v5200_v29 = vcombine.low %v2188_v19, %v2198_v21  ;;  %v403_v31 = vrot.slane %v402_v12, 4  ;;  %v2205_v39 = vrot.slane %v2203_v24, 5  ;;  %v2211_v42 = vrot.slane %v2209_v25, 5  ;;  %v6644_v12 = vld [vmem:[%s6454_s27 + $0x5c] sm:$0x1] }
  0x46   : > { %v2213_v43 = vshrl.u32 %v6607_v8, 16  ;;  %v413_v45 = vrot.slane %v412_v35, 4  ;;  %v2219_v47 = vshll.u32 %v6615_v23, 16  ;;  %v420_v48 = vshrl.u32 %v6619_v27, 16  ;;  %v6648_v24 = vld [vmem:[%s6454_s27 + $0x54] sm:$0xf] }
  0x47   : > { %5807 = vmatprep.mubr.msk.bf16.mxu0 %vm709_vm3, %v5200_v29  ;;  %v408_v44 = vsel %vm6480_vm4, %v403_v31, %v407_v11  ;;  %v2206_v49 = vor.u32 %v2205_v39, %v2202_v38  ;;  %v423_v51 = vshll.u32 %v6619_v27, 16  ;;  %v429_v52 = vshll.u32 %v6622_v36, 16 }
  0x48   : > { %v2215_v50 = vrot.slane %v2213_v43, 4  ;;  %v418_v55 = vsel %vm6480_vm4, %v413_v45, %v417_v37  ;;  %v2221_v56 = vrot.slane %v2219_v47, 5  ;;  %v422_v57 = vrot.slane %v420_v48, 4  ;;  %v6654_v37 = vld [vmem:[%s6454_s27 + $0x58] sm:$0xf] }
  0x49   : > { %v433_v58 = vshrl.u32 %v6622_v36, 16  ;;  %v4974_v59 = vcombine.low %v408_v44, %v418_v55  ;;  %v2207_v61 = vrot.slane %v2206_v49, 4  ;;  %v425_v2 = vrot.slane %v423_v51, 5 }
  0x4a   : > { %v2216_v0 = vor.u32 %v2215_v50, %v2211_v42  ;;  %v431_v5 = vrot.slane %v429_v52, 5  ;;  %v439_v7 = vshll.u32 %v262_v26, 16  ;;  %v2224_v9 = vshrl.u32 %v5165_v53, 16  ;;  %v263_v26 = vld [vmem:[%s6454_s27 + $0x5c] sm:$0x1] }
  0x4b   : > { %v435_v6 = vrot.slane %v433_v58, 4  ;;  %5672 = vmatmul.mubr.msk.bf16.gmra.mrb[8].mxu1 %vm709_vm3, %v4974_v59  ;;  %v2212_v17 = vsel %vm6480_vm4, %v2207_v61, %v2211_v42  ;;  %v426_v11 = vor.u32 %v425_v2, %v422_v57  ;;  %v2227_v13 = vshll.u32 %v5165_v53, 16  ;;  %v5168_v53 = vld [vmem:[%s6454_s27 + $0x60] sm:$0xf]  ;;  %v6668_v59 = vld [vmem:[%s6454_s27 + $0x64] sm:$0xf] }
  0x4c   : > { %v2217_v10 = vrot.slane %v2216_v0, 4  ;;  %v441_v18 = vrot.slane %v439_v7, 5  ;;  %v2226_v19 = vrot.slane %v2224_v9, 4  ;;  %v2233_v21 = vshll.u32 %v6638_v4, 16  ;;  %v6675_v9 = vld [vmem:[%s6454_s27 + $0x68] sm:$0x1] }
  0x4d   : > { %v436_v14 = vor.u32 %v435_v6, %v431_v5  ;;  %v427_v29 = vrot.slane %v426_v11, 4  ;;  %v2229_v31 = vrot.slane %v2227_v13, 5  ;;  %v2237_v35 = vshrl.u32 %v6638_v4, 16 }
  0x4e   : > { %v2222_v25 = vsel %vm6480_vm4, %v2217_v10, %v2221_v56  ;;  %v2235_v42 = vrot.slane %v2233_v21, 5  ;;  %v2243_v43 = vshll.u32 %v6644_v12, 16  ;;  %v444_v48 = vshrl.u32 %v6648_v24, 16 }
  0x4f   : > { %v5201_v38 = vcombine.low %v2212_v17, %v2222_v25  ;;  %v437_v39 = vrot.slane %v436_v14, 4  ;;  %v432_v44 = vsel %vm6480_vm4, %v427_v29, %v431_v5  ;;  %v2230_v45 = vor.u32 %v2229_v31, %v2226_v19  ;;  %v6679_v19 = vld [vmem:[%s6454_s27 + $0x60] sm:$0xf] }
  0x50   : > { %v2239_v47 = vrot.slane %v2237_v35, 4  ;;  %v2245_v50 = vrot.slane %v2243_v43, 5  ;;  %v447_v51 = vshll.u32 %v6648_v24, 16  ;;  %v453_v52 = vshll.u32 %v6654_v37, 16  ;;  %v6685_v35 = vld [vmem:[%s6454_s27 + $0x64] sm:$0xf] }
  0x51   : > { %5808 = vmatmul.mubr.msk.bf16.gmra.mrb[8].mxu0 %vm709_vm3, %v5201_v38  ;;  %v442_v49 = vsel %vm6480_vm4, %v437_v39, %v441_v18  ;;  %v2231_v56 = vrot.slane %v2230_v45, 4  ;;  %v446_v58 = vrot.slane %v444_v48, 4  ;;  %v457_v2 = vshrl.u32 %v6654_v37, 16 }
  0x52   : > { %v4975_v55 = vcombine.low %v432_v44, %v442_v49  ;;  %v2240_v57 = vor.u32 %v2239_v47, %v2235_v42  ;;  %v449_v61 = vrot.slane %v447_v51, 5  ;;  %v455_v0 = vrot.slane %v453_v52, 5 }
  0x53   : > { %v463_v5 = vshll.u32 %v263_v26, 16  ;;  %v2236_v6 = vsel %vm6480_vm4, %v2231_v56, %v2235_v42  ;;  %v2248_v17 = vshrl.u32 %v5168_v53, 16  ;;  %v2251_v10 = vshll.u32 %v5168_v53, 16 }
  0x54   : > { %5675 = vmatprep.mubr.msk.bf16.mxu1 %vm709_vm3, %v4975_v55  ;;  %v2241_v7 = vrot.slane %v2240_v57, 4  ;;  %v450_v11 = vor.u32 %v449_v61, %v446_v58  ;;  %v459_v13 = vrot.slane %v457_v2, 4  ;;  %v2257_v18 = vshll.u32 %v6668_v59, 16  ;;  %v5228_v58 = vld [vmem:[%s6454_s27 + $0xc] sm:$0xe] }
  0x55   : > { %v465_v14 = vrot.slane %v463_v5, 5  ;;  %v2250_v25 = vrot.slane %v2248_v17, 4  ;;  %v2253_v29 = vrot.slane %v2251_v10, 5  ;;  %v2261_v31 = vshrl.u32 %v6668_v59, 16 }
  0x56   : > { %v2246_v21 = vsel %vm6480_vm4, %v2241_v7, %v2245_v50  ;;  %v451_v39 = vrot.slane %v450_v11, 4  ;;  %v460_v42 = vor.u32 %v459_v13, %v455_v0  ;;  %v2259_v43 = vrot.slane %v2257_v18, 5  ;;  %v264_v50 = vld [vmem:[%s6454_s27 + $0x68] sm:$0x1] }
  0x57   : > { %v5202_v38 = vcombine.low %v2236_v6, %v2246_v21  ;;  %v2254_v44 = vor.u32 %v2253_v29, %v2250_v25  ;;  %v2263_v45 = vrot.slane %v2261_v31, 4  ;;  %v2267_v47 = vshll.u32 %v6675_v9, 16  ;;  %v6713_v29 = vld [vmem:[%s6454_s27 + $0x70] sm:$0xf] }
  0x58   : > { %v468_v26 = vshrl.u32 %v6679_v19, 16  ;;  %v456_v48 = vsel %vm6480_vm4, %v451_v39, %v455_v0  ;;  %v461_v49 = vrot.slane %v460_v42, 4  ;;  %v471_v51 = vshll.u32 %v6679_v19, 16  ;;  %v6700_v0 = vld [vmem:[%s6454_s27 + $0x6c] sm:$0xf] }
  0x59   : > { %5811 = vmatprep.mubr.msk.bf16.mxu0 %vm709_vm3, %v5202_v38  ;;  %v477_v52 = vshll.u32 %v6685_v35, 16  ;;  %v2255_v53 = vrot.slane %v2254_v44, 4  ;;  %v2264_v55 = vor.u32 %v2263_v45, %v2259_v43  ;;  %v2269_v56 = vrot.slane %v2267_v47, 5 }
  0x5a   : > { %v470_v57 = vrot.slane %v468_v26, 4  ;;  %v466_v61 = vsel %vm6480_vm4, %v461_v49, %v465_v14  ;;  %v473_v2 = vrot.slane %v471_v51, 5  ;;  %v481_v6 = vshrl.u32 %v6685_v35, 16  ;;  %v265_v26 = vld [vmem:[%s6454_s27 + $0x74] sm:$0x1] }
  0x5b   : > { %v479_v5 = vrot.slane %v477_v52, 5  ;;  %v4976_v7 = vcombine.low %v456_v48, %v466_v61  ;;  %v2260_v17 = vsel %vm6480_vm4, %v2255_v53, %v2259_v43  ;;  %v2265_v10 = vrot.slane %v2264_v55, 4  ;;  %v5229_v48 = vld [vmem:[%s6454_s27 + $0x18] sm:$0xe] }
  0x5c   : > { %v487_v11 = vshll.u32 %v264_v50, 16  ;;  %v474_v14 = vor.u32 %v473_v2, %v470_v57  ;;  %v483_v18 = vrot.slane %v481_v6, 4  ;;  %v5244_v21 = vrot.slane %v5228_v58, 9  ;;  %v6732_v53 = vld [vmem:[%s6454_s27 + $0x78] sm:$0xf] }
  0x5d   : > { %v2825_v25 = vrot.slane %v2823_v62, 4  ;;  %5676 = vmatmul.mubr.msk.bf16.gmra.mrb[12].mxu1 %vm709_vm3, %v4976_v7  ;;  %v2270_v31 = vsel %vm6480_vm4, %v2265_v10, %v2269_v56  ;;  %v492_v39 = vshrl.u32 %v6700_v0, 16  ;;  %v495_v42 = vshll.u32 %v6700_v0, 16  ;;  %v266_v57 = vld [vmem:[%s6454_s27 + $0x80] sm:$0x1] }
  0x5e   : > { %v489_v38 = vrot.slane %v487_v11, 5  ;;  %v5203_v43 = vcombine.low %v2260_v17, %v2270_v31  ;;  %v475_v44 = vrot.slane %v474_v14, 4  ;;  %v484_v45 = vor.u32 %v483_v18, %v479_v5  ;;  %v5230_v10 = vld [vmem:[%s6454_s27 + $0x24] sm:$0xe] }
  0x5f   : > { %v2824_v47 = vsel %vm6706_vm7, %v5244_v21, %v2823_v62  ;;  %v2827_v49 = vsel %vm6706_vm7, %v2825_v25, %v2826_v63  ;;  %v494_v50 = vrot.slane %v492_v39, 4  ;;  %v497_v51 = vrot.slane %v495_v42, 5  ;;  %v6758_v39 = vld [vmem:[%s6454_s27 + $0x84] sm:$0xf] }
  0x60   : > { %v501_v52 = vshll.u32 %v6713_v29, 16  ;;  %5812 = vmatmul.mubr.msk.bf16.gmra.mrb[12].mxu0 %vm709_vm3, %v5203_v43  ;;  %v480_v15 = vsel %vm6480_vm4, %v475_v44, %v479_v5  ;;  %v485_v62 = vrot.slane %v484_v45, 4  ;;  %v5261_v55 = vcombine.low %v2824_v47, %v2827_v49  ;;  %v6766_v43 = vld [vmem:[%s6454_s27 + $0x88] sm:$0xf] }
  0x61   : > { %v505_v56 = vshrl.u32 %v6713_v29, 16  ;;  %v498_v63 = vor.u32 %v497_v51, %v494_v50  ;;  %v511_v61 = vshll.u32 %v265_v26, 16  ;;  %v5245_v2 = vrot.slane %v5229_v48, 9 }
  0x62   : > { %v503_v58 = vrot.slane %v501_v52, 5  ;;  %v490_v6 = vsel %vm6480_vm4, %v485_v62, %v489_v38  ;;  %5833 = vmatprep.mubr.msk.bf16.mxu0 %vm709_vm3, %v5261_v55  ;;  %v2834_v5 = vsel %vm6706_vm7, %v6523_v30, %v2833_v28  ;;  %v516_v17 = vshrl.u32 %v6732_v53, 16  ;;  %v267_v52 = vld [vmem:[%s6454_s27 + $0x8c] sm:$0x1] }
  0x63   : > { %v507_v7 = vrot.slane %v505_v56, 4  ;;  %v4977_v11 = vcombine.low %v480_v15, %v490_v6  ;;  %v499_v14 = vrot.slane %v498_v63, 4  ;;  %v513_v18 = vrot.slane %v511_v61, 5 }
  0x64   : > { %v2831_v21 = vsel %vm6706_vm7, %v5245_v2, %v2830_v22  ;;  %v518_v38 = vrot.slane %v516_v17, 4  ;;  %v519_v1 = vshll.u32 %v6732_v53, 16  ;;  %v525_v30 = vshll.u32 %v6739_v16, 16  ;;  %v6771_v22 = vld [vmem:[%s8215_s1 + $0xe] sm:$0x3] }
  0x65   : > { %v508_v25 = vor.u32 %v507_v7, %v503_v58  ;;  %v5262_v31 = vcombine.low %v2831_v21, %v2834_v5  ;;  %5679 = vmatprep.mubr.msk.bf16.mxu1 %vm709_vm3, %v4977_v11  ;;  %v504_v28 = vsel %vm6480_vm4, %v499_v14, %v503_v58  ;;  %v529_v60 = vshrl.u32 %v6739_v16, 16  ;;  %v6790_v5 = vld [vmem:[%s6454_s27 + $0x90] sm:$0xf] }
  0x66   : > { %v535_v42 = vshll.u32 %v266_v57, 16  ;;  %v521_v45 = vrot.slane %v519_v1, 5  ;;  %v5246_v47 = vrot.slane %v5230_v10, 9  ;;  %v2837_v26 = vrot.slane %v6530_v46, 5  ;;  %v5231_v57 = vld [vmem:[%s6454_s27 + $0x30] sm:$0xe] }
  0x67   : > { %v509_v44 = vrot.slane %v508_v25, 4  ;;  %v527_v48 = vrot.slane %v525_v30, 5  ;;  %v531_v49 = vrot.slane %v529_v60, 4  ;;  %v2840_v51 = vrot.slane %v6539_v54, 5  ;;  %v6802_v30 = vld [vmem:[%s6454_s27 + $0x94] sm:$0xf] }
  0x68   : > { %v537_v50 = vrot.slane %v535_v42, 5  ;;  %5834 = vmatmul.mubr.msk.bf16.vlgmr.msra.gmra.mrb[0].mxu0 %vm709_vm3, %v5262_v31  ;;  %v522_v62 = vor.u32 %v521_v45, %v518_v38  ;;  %v2838_v55 = vsel %vm6706_vm7, %v5246_v47, %v2837_v26  ;;  %v2839_v56 = vrot.slane %v2837_v26, 4  ;;  %v268_v60 = vld [vmem:[%s6454_s27 + $0x98] sm:$0x1]  ;;  %v5232_v26 = vld [vmem:[%s6454_s27 + $0x3c] sm:$0xe] }
  0x69   : > { %v514_v15 = vsel %vm6480_vm4, %v509_v44, %v513_v18  ;;  %5866 = vmatpush3.bf16.msra.mxu0 %v6490_v41  ;;  %v532_v46 = vor.u32 %v531_v49, %v527_v48  ;;  %v540_v58 = vshrl.u32 %v6758_v39, 16  ;;  %v543_v54 = vshll.u32 %v6758_v39, 16 }
  0x6a   : > { %v4978_v63 = vcombine.low %v504_v28, %v514_v15  ;;  %v523_v61 = vrot.slane %v522_v62, 4  ;;  %v2841_v2 = vsel %vm6706_vm7, %v2839_v56, %v2840_v51  ;;  %v549_v6 = vshll.u32 %v6766_v43, 16  ;;  %6233 = vmatprep.subr.msk.bf16.mxu0 %vm758_vm0, %v6771_v22 }
  0x6b   : > { %v553_v7 = vshrl.u32 %v6766_v43, 16  ;;  %v533_v41 = vrot.slane %v532_v46, 4  ;;  %v5263_v17 = vcombine.low %v2838_v55, %v2841_v2  ;;  %v542_v10 = vrot.slane %v540_v58, 4  ;;  %v6822_v46 = vld [vmem:[%s6454_s27 + $0xa0] sm:$0xf] }
  0x6c   : > { %5680 = vmatmul.mubr.msk.bf16.gmra.mrb[16].mxu1 %vm709_vm3, %v4978_v63  ;;  %v545_v11 = vrot.slane %v543_v54, 5  ;;  %v528_v14 = vsel %vm6480_vm4, %v523_v61, %v527_v48  ;;  %v551_v18 = vrot.slane %v549_v6, 5  ;;  %v559_v25 = vshll.u32 %v267_v52, 16  ;;  %v6811_v52 = vld [vmem:[%s6454_s27 + $0x9c] sm:$0xf] }
  0x6d   : > { %v555_v21 = vrot.slane %v553_v7, 4  ;;  %v538_v31 = vsel %vm6480_vm4, %v533_v41, %v537_v50  ;;  %5837 = vmatprep.mubr.msk.bf16.mxu0 %vm709_vm3, %v5263_v17  ;;  %v5247_v1 = vrot.slane %v5231_v57, 9  ;;  %v2844_v28 = vrot.slane %v6559_v33, 5 }
  0x6e   : > { %v546_v38 = vor.u32 %v545_v11, %v542_v10  ;;  %v4979_v42 = vcombine.low %v528_v14, %v538_v31  ;;  %v561_v45 = vrot.slane %v559_v25, 5  ;;  %v2847_v47 = vrot.slane %v6567_v40, 5  ;;  %v269_v10 = vld [vmem:[%s6454_s27 + $0xa4] sm:$0x1]  ;;  %v5233_v11 = vld [vmem:[%s6454_s27 + $0x48] sm:$0xe] }
  0x6f   : > { %v556_v44 = vor.u32 %v555_v21, %v551_v18  ;;  %v2845_v49 = vsel %vm6706_vm7, %v5247_v1, %v2844_v28  ;;  %v2846_v50 = vrot.slane %v2844_v28, 4  ;;  %v564_v51 = vshrl.u32 %v6790_v5, 16 }
  0x70   : > { %v547_v48 = vrot.slane %v546_v38, 4  ;;  %5683 = vmatprep.mubr.msk.bf16.mxu1 %vm709_vm3, %v4979_v42  ;;  %v567_v15 = vshll.u32 %v6790_v5, 16  ;;  %v573_v62 = vshll.u32 %v6802_v30, 16  ;;  %v577_v40 = vshrl.u32 %v6802_v30, 16 }
  0x71   : > { %v557_v33 = vrot.slane %v556_v44, 4  ;;  %v2848_v56 = vsel %vm6706_vm7, %v2846_v50, %v2847_v47  ;;  %v566_v57 = vrot.slane %v564_v51, 4  ;;  %v583_v63 = vshll.u32 %v268_v60, 16 }
  0x72   : > { %v552_v55 = vsel %vm6480_vm4, %v547_v48, %v551_v18  ;;  %v5264_v54 = vcombine.low %v2845_v49, %v2848_v56  ;;  %v569_v61 = vrot.slane %v567_v15, 5  ;;  %v575_v2 = vrot.slane %v573_v62, 5  ;;  %v6848_v56 = vld [vmem:[%s6454_s27 + $0xac] sm:$0xf] }
  0x73   : > { %v562_v58 = vsel %vm6480_vm4, %v557_v33, %v561_v45  ;;  %v579_v7 = vrot.slane %v577_v40, 4  ;;  %v585_v41 = vrot.slane %v583_v63, 5  ;;  %v5248_v17 = vrot.slane %v5232_v26, 9  ;;  %v6843_v33 = vld [vmem:[%s6454_s27 + $0xa8] sm:$0xf] }
  0x74   : > { %v4980_v6 = vcombine.low %v552_v55, %v562_v58  ;;  %5838 = vmatmul.mubr.msk.bf16.gmra.mrb[4].mxu0 %vm709_vm3, %v5264_v54  ;;  %v570_v14 = vor.u32 %v569_v61, %v566_v57  ;;  %v2851_v18 = vrot.slane %v6584_v20, 5  ;;  %v2854_v21 = vrot.slane %v6589_v34, 5  ;;  %v270_v61 = vld [vmem:[%s6454_s27 + $0xb0] sm:$0x1] }
  0x75   : > { %v588_v25 = vshrl.u32 %v6811_v52, 16  ;;  %v580_v31 = vor.u32 %v579_v7, %v575_v2  ;;  %v591_v38 = vshll.u32 %v6811_v52, 16  ;;  %v597_v1 = vshll.u32 %v6822_v46, 16 }
  0x76   : > { %5684 = vmatmul.mubr.msk.bf16.gmra.mrb[20].mxu1 %vm709_vm3, %v4980_v6  ;;  %v601_v28 = vshrl.u32 %v6822_v46, 16  ;;  %v571_v60 = vrot.slane %v570_v14, 4  ;;  %v2852_v42 = vsel %vm6706_vm7, %v5248_v17, %v2851_v18  ;;  %v2853_v20 = vrot.slane %v2851_v18, 4  ;;  %v6863_v14 = vld [vmem:[%s6454_s27 + $0xb4] sm:$0xf] }
  0x77   : > { %v590_v44 = vrot.slane %v588_v25, 4  ;;  %v581_v34 = vrot.slane %v580_v31, 4  ;;  %v593_v45 = vrot.slane %v591_v38, 5  ;;  %v599_v47 = vrot.slane %v597_v1, 5 }
  0x78   : > { %v603_v26 = vrot.slane %v601_v28, 4  ;;  %v576_v48 = vsel %vm6480_vm4, %v571_v60, %v575_v2  ;;  %v2855_v49 = vsel %vm6706_vm7, %v2853_v20, %v2854_v21  ;;  %v607_v50 = vshll.u32 %v269_v10, 16  ;;  %v5234_v2 = vld [vmem:[%s6454_s27 + $0x54] sm:$0xe] }
  0x79   : > { %v5249_v51 = vrot.slane %v5233_v11, 9  ;;  %v586_v15 = vsel %vm6480_vm4, %v581_v34, %v585_v41  ;;  %v5265_v62 = vcombine.low %v2852_v42, %v2855_v49  ;;  %v594_v40 = vor.u32 %v593_v45, %v590_v44  ;;  %v6872_v42 = vld [vmem:[%s6454_s27 + $0xb8] sm:$0xf]  ;;  %v271_v49 = vld [vmem:[%s6454_s27 + $0xbc] sm:$0x1] }
  0x7a   : > { %v604_v55 = vor.u32 %v603_v26, %v599_v47  ;;  %v4981_v57 = vcombine.low %v576_v48, %v586_v15  ;;  %v609_v63 = vrot.slane %v607_v50, 5  ;;  %v2858_v58 = vrot.slane %v6607_v8, 5 }
  0x7b   : > { %v2861_v54 = vrot.slane %v6615_v23, 5  ;;  %5841 = vmatprep.mubr.msk.bf16.mxu0 %vm709_vm3, %v5265_v62  ;;  %v595_v6 = vrot.slane %v594_v40, 4  ;;  %v612_v41 = vshrl.u32 %v6843_v33, 16  ;;  %v615_v17 = vshll.u32 %v6843_v33, 16 }
  0x7c   : > { %v605_v7 = vrot.slane %v604_v55, 4  ;;  %5687 = vmatprep.mubr.msk.bf16.mxu1 %vm709_vm3, %v4981_v57  ;;  %v2859_v10 = vsel %vm6706_vm7, %v5249_v51, %v2858_v58  ;;  %v2860_v11 = vrot.slane %v2858_v58, 4  ;;  %v621_v8 = vshll.u32 %v6848_v56, 16  ;;  %v5235_v55 = vld [vmem:[%s6454_s27 + $0x60] sm:$0xe] }
  0x7d   : > { %v625_v23 = vshrl.u32 %v6848_v56, 16  ;;  %v600_v18 = vsel %vm6480_vm4, %v595_v6, %v599_v47  ;;  %v614_v25 = vrot.slane %v612_v41, 4  ;;  %v617_v31 = vrot.slane %v615_v17, 5  ;;  %v5236_v6 = vld [vmem:[%s6454_s27 + $0x6c] sm:$0xe] }
  0x7e   : > { %v610_v21 = vsel %vm6480_vm4, %v605_v7, %v609_v63  ;;  %v2862_v1 = vsel %vm6706_vm7, %v2860_v11, %v2861_v54  ;;  %v623_v28 = vrot.slane %v621_v8, 5  ;;  %v631_v34 = vshll.u32 %v270_v61, 16  ;;  %v5172_v11 = vld [vmem:[%s6454_s27 + $0x70] sm:$0xf]  ;;  %v5173_v8 = vld [vmem:[%s6454_s27 + $0x74] sm:$0x1] }
  0x7f   : > { %v4982_v38 = vcombine.low %v600_v18, %v610_v21  ;;  %v627_v60 = vrot.slane %v625_v23, 4  ;;  %v5266_v20 = vcombine.low %v2859_v10, %v2862_v1  ;;  %v618_v44 = vor.u32 %v617_v31, %v614_v25 }
  0x80   : > { %v5250_v45 = vrot.slane %v5234_v2, 9  ;;  %v2865_v26 = vrot.slane %v6638_v4, 5  ;;  %v2868_v48 = vrot.slane %v6644_v12, 5  ;;  %v636_v50 = vshrl.u32 %v6863_v14, 16 }
  0x81   : > { %5688 = vmatmul.mubr.msk.bf16.gmra.mrb[24].mxu1 %vm709_vm3, %v4982_v38  ;;  %v628_v47 = vor.u32 %v627_v60, %v623_v28  ;;  %5842 = vmatmul.mubr.msk.bf16.gmra.mrb[8].mxu0 %vm709_vm3, %v5266_v20  ;;  %v619_v51 = vrot.slane %v618_v44, 4  ;;  %v633_v15 = vrot.slane %v631_v34, 5  ;;  %v639_v62 = vshll.u32 %v6863_v14, 16 }
  0x82   : > { %v645_v40 = vshll.u32 %v6872_v42, 16  ;;  %v2866_v4 = vsel %vm6706_vm7, %v5250_v45, %v2865_v26  ;;  %v2867_v12 = vrot.slane %v2865_v26, 4  ;;  %v638_v63 = vrot.slane %v636_v50, 4 }
  0x83   : > { %v629_v57 = vrot.slane %v628_v47, 4  ;;  %v624_v58 = vsel %vm6480_vm4, %v619_v51, %v623_v28  ;;  %v641_v54 = vrot.slane %v639_v62, 5  ;;  %v649_v2 = vshrl.u32 %v6872_v42, 16  ;;  %v5237_v47 = vld [vmem:[%s6454_s27 + $0x78] sm:$0xe] }
  0x84   : > { %v647_v61 = vrot.slane %v645_v40, 5  ;;  %v2869_v41 = vsel %vm6706_vm7, %v2867_v12, %v2868_v48  ;;  %v655_v17 = vshll.u32 %v271_v49, 16  ;;  %v5251_v10 = vrot.slane %v5235_v55, 9  ;;  %v6308_v51 = vld [vmem:[%s6454_s27] sm:$0xf] }
  0x85   : > { %v634_v7 = vsel %vm6480_vm4, %v629_v57, %v633_v15  ;;  %v5267_v18 = vcombine.low %v2866_v4, %v2869_v41  ;;  %v642_v21 = vor.u32 %v641_v54, %v638_v63  ;;  %v651_v25 = vrot.slane %v649_v2, 4  ;;  %v6910_v15 = vld [vmem:[%s6454_s27 + $0x4] sm:$0xf]  ;;  %v6914_v40 = vld [vmem:[%s6454_s27 + $0x7c] sm:$0xf] }
  0x86   : > { %v4983_v23 = vcombine.low %v624_v58, %v634_v7  ;;  %v657_v31 = vrot.slane %v655_v17, 5  ;;  %v2872_v38 = vrot.slane %v6668_v59, 5  ;;  %v2875_v1 = vrot.slane %v6675_v9, 5  ;;  %v6917_v55 = vld [vmem:[%s6454_s27 + $0x80] sm:$0x1] }
  0x87   : > { %v5252_v28 = vrot.slane %v5236_v6, 9  ;;  %5845 = vmatprep.mubr.msk.bf16.mxu0 %vm709_vm3, %v5267_v18  ;;  %v643_v60 = vrot.slane %v642_v21, 4  ;;  %v652_v20 = vor.u32 %v651_v25, %v647_v61  ;;  %v2879_v44 = vrot.slane %v5172_v11, 5  ;;  %v5178_v57 = vld [vmem:[%s6454_s27 + $0x88] sm:$0xf] }
  0x88   : > { %5691 = vmatprep.mubr.msk.bf16.mxu1 %vm709_vm3, %v4983_v23  ;;  %v2882_v34 = vrot.slane %v5173_v8, 5  ;;  %v2873_v45 = vsel %vm6706_vm7, %v5251_v10, %v2872_v38  ;;  %v2874_v59 = vrot.slane %v2872_v38, 4  ;;  %v5001_v62 = vcombine.low %v6308_v51, %v6910_v15  ;;  %v5179_v54 = vld [vmem:[%s6454_s27 + $0x8c] sm:$0x1]  ;;  %v5181_v17 = vld [vmem:[%s6454_s27 + $0x94] sm:$0xf] }
  0x89   : > { %v648_v9 = vsel %vm6480_vm4, %v643_v60, %v647_v61  ;;  %v653_v26 = vrot.slane %v652_v20, 4  ;;  %v2880_v48 = vsel %vm6706_vm7, %v5252_v28, %v2879_v44  ;;  %v2881_v49 = vrot.slane %v2879_v44, 4  ;;  %v5238_v61 = vld [vmem:[%s6454_s27 + $0x84] sm:$0xe]  ;;  %v5239_v23 = vld [vmem:[%s6454_s27 + $0x90] sm:$0xe] }
  0x8a   : > { %v2876_v50 = vsel %vm6706_vm7, %v2874_v59, %v2875_v1  ;;  %v5253_v58 = vrot.slane %v5237_v47, 9  ;;  %v2886_v7 = vrot.slane %v6914_v40, 5  ;;  %v2889_v41 = vrot.slane %v6917_v55, 5  ;;  %v5182_v25 = vld [vmem:[%s6454_s27 + $0x98] sm:$0x1] }
  0x8b   : > { %v658_v4 = vsel %vm6480_vm4, %v653_v26, %v657_v31  ;;  %v5268_v12 = vcombine.low %v2873_v45, %v2876_v50  ;;  %v2883_v63 = vsel %vm6706_vm7, %v2881_v49, %v2882_v34  ;;  %v5254_v10 = vrot.slane %v5238_v61, 9  ;;  %v5184_v31 = vld [vmem:[%s6454_s27 + $0xa0] sm:$0xf]  ;;  %v5185_v60 = vld [vmem:[%s6454_s27 + $0xa4] sm:$0x1] }
  0x8c   : > { %v4984_v2 = vcombine.low %v648_v9, %v658_v4  ;;  %v5269_v6 = vcombine.low %v2880_v48, %v2883_v63  ;;  %v2893_v11 = vrot.slane %v5178_v57, 5  ;;  %v2896_v8 = vrot.slane %v5179_v54, 5  ;;  %v5240_v20 = vld [vmem:[%s6454_s27 + $0x9c] sm:$0xe]  ;;  %v6310_v44 = vld [vmem:[%s6454_s27 + $0xc] sm:$0xf] }
  0x8d   : > { %5846 = vmatmul.mubr.msk.bf16.gmra.mrb[12].mxu0 %vm709_vm3, %v5268_v12  ;;  %v2887_v18 = vsel %vm6706_vm7, %v5253_v58, %v2886_v7  ;;  %v2888_v21 = vrot.slane %v2886_v7, 4  ;;  %v2900_v28 = vrot.slane %v5181_v17, 5  ;;  %v6944_v34 = vld [vmem:[%s6454_s27 + $0x10] sm:$0xf]  ;;  %v6312_v47 = vld [vmem:[%s6454_s27 + $0x18] sm:$0xf] }
  0x8e   : > { %5692 = vmatmul.mubr.msk.bf16.gmra.mrb[28].mxu1 %vm709_vm3, %v4984_v2  ;;  %5849 = vmatprep.mubr.msk.bf16.mxu0 %vm709_vm3, %v5269_v6  ;;  %v2894_v38 = vsel %vm6706_vm7, %v5254_v10, %v2893_v11  ;;  %v2895_v1 = vrot.slane %v2893_v11, 4  ;;  %v5002_v45 = vcombine.low %v6310_v44, %v6944_v34  ;;  %v6951_v9 = vld [vmem:[%s6454_s27 + $0x1c] sm:$0xf]  ;;  %v5255_v48 = vrot.slane %v5239_v23, 9  ;;  %v5187_v57 = vld [vmem:[%s6454_s27 + $0xac] sm:$0xf] }
  0x8f   : > { %5697 = vmatprep.mubr.msk.bf16.mxu1 %vm709_vm3, %v5001_v62  ;;  %v2890_v59 = vsel %vm6706_vm7, %v2888_v21, %v2889_v41  ;;  %v5003_v26 = vcombine.low %v6312_v47, %v6951_v9  ;;  %v2902_v51 = vrot.slane %v2900_v28, 4  ;;  %v2903_v62 = vrot.slane %v5182_v25, 5  ;;  %v6314_v54 = vld [vmem:[%s8215_s1 + $0x4] sm:$0x3]  ;;  %v5190_v2 = vld [vmem:[%s6454_s27 + $0xb8] sm:$0xf] }
  0x90   : > { %v5270_v49 = vcombine.low %v2887_v18, %v2890_v59  ;;  %v2897_v50 = vsel %vm6706_vm7, %v2895_v1, %v2896_v8  ;;  %v5256_v12 = vrot.slane %v5240_v20, 9  ;;  %v2907_v63 = vrot.slane %v5184_v31, 5  ;;  %v6966_v7 = vld [vmem:[%s8215_s1 + $0x6] sm:$0x3]  ;;  %v5188_v10 = vld [vmem:[%s6454_s27 + $0xb0] sm:$0x1] }
  0x91   : > { %v5271_v4 = vcombine.low %v2894_v38, %v2897_v50  ;;  %v2910_v58 = vrot.slane %v5185_v60, 5  ;;  %v1477_v61 = vsel %vm758_vm0, %v6314_v54, 0  ;;  %v2901_v41 = vsel %vm6706_vm7, %v5255_v48, %v2900_v28  ;;  %v5241_v11 = vld [vmem:[%s6454_s27 + $0xa8] sm:$0xe]  ;;  %v5191_v25 = vld [vmem:[%s6454_s27 + $0xbc] sm:$0x1] }
  0x92   : > { %v2909_v6 = vrot.slane %v2907_v63, 4  ;;  %v2904_v17 = vsel %vm6706_vm7, %v2902_v51, %v2903_v62  ;;  %v2914_v8 = vrot.slane %v5187_v57, 5  ;;  %v2908_v23 = vsel %vm6706_vm7, %v5256_v12, %v2907_v63  ;;  %v5242_v31 = vld [vmem:[%s6454_s27 + $0xb4] sm:$0xe]  ;;  %v6315_v38 = vld [vmem:[%s6454_s27 + $0x24] sm:$0xf] }
  0x93   : > { %v2921_v21 = vrot.slane %v5190_v2, 5  ;;  %v6987_v1 = vld [vmem:[%s6454_s27 + $0x28] sm:$0xf]  ;;  %v5272_v60 = vcombine.low %v2901_v41, %v2904_v17  ;;  %v5257_v44 = vrot.slane %v5241_v11, 9  ;;  %v2917_v59 = vrot.slane %v5188_v10, 5 }
  0x94   : > { %v2911_v18 = vsel %vm6706_vm7, %v2909_v6, %v2910_v58  ;;  %v5004_v28 = vcombine.low %v6315_v38, %v6987_v1  ;;  %v6317_v47 = vld [vmem:[%s6454_s27 + $0x30] sm:$0xf]  ;;  %v2924_v51 = vrot.slane %v5191_v25, 5  ;;  %v5193_v62 = vld [vmem:[%s6454_s27 + $0xc4] sm:$0xf]  ;;  %v2309_v25 = vshrl.u32 %v6914_v40, 16 }
  0x95   : > { %5850 = vmatmul.mubr.msk.bf16.gmra.mrb[16].mxu0 %vm709_vm3, %v5270_v49  ;;  %v5273_v20 = vcombine.low %v2908_v23, %v2911_v18  ;;  %v5258_v49 = vrot.slane %v5242_v31, 9  ;;  %v2923_v50 = vrot.slane %v2921_v21, 4  ;;  %v2915_v57 = vsel %vm6706_vm7, %v5257_v44, %v2914_v8  ;;  %v5243_v12 = vld [vmem:[%s6454_s27 + $0xc0] sm:$0xe]  ;;  %v6319_v41 = vld [vmem:[%s6454_s27 + $0x3c] sm:$0xf] }
  0x96   : > { %5698 = vmatmul.mubr.msk.bf16.vlgmr.msra.gmra.mrb[0].mxu1 %vm709_vm3, %v5002_v45  ;;  %5853 = vmatprep.mubr.msk.bf16.mxu0 %vm709_vm3, %v5271_v4  ;;  %v2916_v45 = vrot.slane %v2914_v8, 4  ;;  %v2928_v63 = vrot.slane %v5193_v62, 5  ;;  %v5259_v6 = vrot.slane %v5243_v12, 9  ;;  %v7012_v17 = vld [vmem:[%s6454_s27 + $0x40] sm:$0xf]  ;;  %v5007_v18 = vcombine.low %v6619_v27, %v6622_v36  ;;  %v6271_v62 = vld [vmem:[%s6454_s27 + $0x24] sm:$0xff]  }
  0x97   : > { %5730 = vmatpush3.bf16.msra.mxu1 %v1477_v61  ;;  %5701 = vmatprep.mubr.msk.bf16.mxu1 %vm709_vm3, %v5003_v26  ;;  %v6992_v26 = vld [vmem:[%s6454_s27 + $0x34] sm:$0xf]  ;;  %v2922_v58 = vsel %vm6706_vm7, %v5258_v49, %v2921_v21  ;;  %v2925_v54 = vsel %vm6706_vm7, %v2923_v50, %v2924_v51  ;;  %v5194_v61 = vld [vmem:[%s6454_s27 + $0xc8] sm:$0x1]  ;;  %v5006_v10 = vcombine.low %v6319_v41, %v7012_v17  ;;  %v2305_v21 = vshll.u32 %v6914_v40, 16 }
  0x98   : > { %6228 = vmatprep.subr.msk.bf16.mxu1 %vm758_vm0, %v6966_v7  ;;  %v5005_v48 = vcombine.low %v6317_v47, %v6992_v26  ;;  %v2918_v4 = vsel %vm6706_vm7, %v2916_v45, %v2917_v59  ;;  %v5275_v11 = vcombine.low %v2922_v58, %v2925_v54  ;;  %v2930_v8 = vrot.slane %v2928_v63, 4  ;;  %v1215_v45 = vld [vmem:[%s6454_s27] sm:$0xe]  ;;  %v1216_v59 = vld [vmem:[%s6454_s27 + $0xc] sm:$0xe] }
  0x99   : > { %v5274_v2 = vcombine.low %v2915_v57, %v2918_v4  ;;  %v2931_v23 = vrot.slane %v5194_v61, 5  ;;  %v2929_v31 = vsel %vm6706_vm7, %v5259_v6, %v2928_v63  ;;  %v7027_v27 = vrot.slane %v2305_v21, 5  ;;  %v1219_v41 = vld [vmem:[%s6454_s27 + $0x30] sm:$0xe] }
  0x9a   : > { %v2311_v36 = vrot.slane %v2309_v25, 4  ;;  %v5009_v44 = vcombine.low %v6679_v19, %v6685_v35  ;;  %v2315_v47 = vshll.u32 %v6917_v55, 16  ;;  %v5033_v19 = vrot.slane %v1215_v45, 9 }
  0x9b   : > { %v2932_v38 = vsel %vm6706_vm7, %v2930_v8, %v2931_v23  ;;  %8236 = vst [vmem:[#allocation3_spill] sm:$0xff] %v7027_v27  ;;  %v5034_v35 = vrot.slane %v1216_v59, 9  ;;  %v1282_v4 = vrot.slane %v6951_v9, 5  ;;  %v1289_v12 = vrot.slane %v6987_v1, 5  ;;  %v1220_v8 = vld [vmem:[%s6454_s27 + $0x3c] sm:$0xe] }
  0x9c   : > { %v5276_v40 = vcombine.low %v2929_v31, %v2932_v38  ;;  %v2312_v49 = vor.u32 %v2311_v36, %v7027_v27  ;;  %v7047_v51 = vrot.slane %v2315_v47, 5  ;;  %v5010_v58 = vcombine.low %v6700_v0, %v6713_v29  ;;  %v1221_v31 = vld [vmem:[%s6454_s27 + $0x48] sm:$0xe]  ;;  %v6325_v59 = vld [vmem:[%s6454_s27 + $0x38] sm:$0x1] }
  0x9d   : > { %5854 = vmatmul.mubr.msk.bf16.gmra.mrb[20].mxu0 %vm709_vm3, %v5272_v60  ;;  %v5008_v60 = vcombine.low %v6648_v24, %v6654_v37  ;;  %v6322_v24 = vld [vmem:[%s6454_s27 + $0x14] sm:$0x1]  ;;  %v4117_v54 = vsel %vm758_vm0, %v6771_v22, 0  ;;  %v5011_v61 = vcombine.low %v6732_v53, %v6739_v16  ;;  %v5012_v6 = vcombine.low %v6758_v39, %v6766_v43  ;;  %v6323_v16 = vld [vmem:[%s6454_s27 + $0x20] sm:$0x1] }
  0x9e   : > { %5702 = vmatmul.mubr.msk.bf16.gmra.mrb[4].mxu1 %vm709_vm3, %v5004_v28  ;;  %5857 = vmatprep.mubr.msk.bf16.mxu0 %vm709_vm3, %v5273_v20  ;;  %v1275_v28 = vrot.slane %v6944_v34, 5  ;;  %v6269_v20 = vld [vmem:[%s6454_s27 + $0x18] sm:$0xff]   ;;  %v6321_v34 = vld [vmem:[%s6454_s27 + $0x8] sm:$0x1]  ;;  %v1278_v37 = vrot.slane %v6322_v24, 5  ;;  %8237 = vst [vmem:[#allocation4_spill] sm:$0xff] %v7047_v51  ;;  %v5013_v9 = vcombine.low %v6790_v5, %v6802_v30 }
  0x9f   : > { %5705 = vmatprep.mubr.msk.bf16.mxu1 %vm709_vm3, %v5005_v48  ;;  %v1268_v48 = vrot.slane %v6910_v15, 5  ;;  %v1271_v50 = vrot.slane %v6321_v34, 5  ;;  %v1217_v15 = vld [vmem:[%s6454_s27 + $0x18] sm:$0xe]  ;;  %v7052_v63 = vrot.slane %v2312_v49, 4  ;;  %v1285_v22 = vrot.slane %v6323_v16, 5 }
  0xa0   : > { %v1277_v55 = vrot.slane %v1275_v28, 4  ;;  %v5035_v1 = vrot.slane %v1217_v15, 9  ;;  %v7074_v29 = vsel %vm6706_vm7, %v5034_v35, %v1275_v28  ;;  %v1291_v25 = vrot.slane %v1289_v12, 4  ;;  %v5358_v24 = vld [vmem:[%s6454_s27 + $0x18] sm:$0xf] }
  0xa1   : > { %v1270_v57 = vrot.slane %v1268_v48, 4  ;;  %8238 = vst [vmem:[#allocation5_spill] sm:$0xff] %v7052_v63  ;;  %v7070_v0 = vsel %vm6706_vm7, %v5033_v19, %v1268_v48  ;;  %v1299_v47 = vrot.slane %v6325_v59, 5  ;;  %v7111_v49 = vsel %vm758_vm0, %v6966_v7, 0  ;;  %v5359_v7 = vld [vmem:[%s6454_s27 + $0x1c] sm:$0xf] }
  0xa2   : > { %v7078_v53 = vsel %vm6706_vm7, %v1277_v55, %v1278_v37  ;;  %v7115_v34 = vsel %vm6706_vm7, %v5035_v1, %v1282_v4  ;;  %v6275_v37 = vld [vmem:[%s6454_s27 + $0x3c] sm:$0xff]   ;;  %v5038_v35 = vrot.slane %v1220_v8, 9  ;;  %v6326_v55 = vld [vmem:[%s6454_s27 + $0x44] sm:$0x1]  ;;  %v3638_v8 = vshll.u32 %v5358_v24, 16 }
  0xa3   : > { %v7089_v23 = vsel %vm6706_vm7, %v1270_v57, %v1271_v50  ;;  %v1222_v50 = vld [vmem:[%s6454_s27 + $0x54] sm:$0xe]  ;;  %v1306_v15 = vrot.slane %v6326_v55, 5  ;;  %v5362_v39 = vld [vmem:[%s6454_s27 + $0x28] sm:$0xf] }
  0xa4   : > { %v6333_v5 = vld [vmem:[%s6454_s27 + $0x70] sm:$0xf] }
  0xa5   : > { %5858 = vmatmul.mubr.msk.bf16.gmra.mrb[24].mxu0 %vm709_vm3, %v5274_v2  ;;  %v1218_v2 = vld [vmem:[%s6454_s27 + $0x24] sm:$0xe]  ;;  %v1331_v30 = vrot.slane %v6333_v5, 5 }
  0xa6   : > { %5706 = vmatmul.mubr.msk.bf16.gmra.mrb[8].mxu1 %vm709_vm3, %v5006_v10  ;;  %5861 = vmatprep.mubr.msk.bf16.mxu0 %vm709_vm3, %v5275_v11  ;;  %v1296_v10 = vrot.slane %v6992_v26, 5  ;;  %v6273_v11 = vld [vmem:[%s6454_s27 + $0x30] sm:$0xff]   ;;  %v5036_v21 = vrot.slane %v1218_v2, 9 }
  0xa7   : > { %5709 = vmatprep.mubr.msk.bf16.mxu1 %vm709_vm3, %v5007_v18  ;;  %v7085_v26 = vld [vmem:[%s8215_s1 + $0x10] sm:$0x3]  ;;  %v1284_v18 = vrot.slane %v1282_v4, 4  ;;  %v1333_v48 = vrot.slane %v1331_v30, 4 }
  0xa8   : > { %v1298_v45 = vrot.slane %v1296_v10, 4  ;;  %v7122_v19 = vsel %vm6706_vm7, %v5036_v21, %v1289_v12  ;;  %v3648_v21 = vshrl.u32 %v5359_v7, 16 }
  0xa9   : > { %v7131_v4 = vsel %vm6706_vm7, %v1284_v18, %v1285_v22  ;;  %v3635_v22 = vshrl.u32 %v5358_v24, 16  ;;  %v3644_v18 = vshll.u32 %v5359_v7, 16  ;;  %v5361_v24 = vld [vmem:[%s6454_s27 + $0x24] sm:$0xf] }
  0xaa   : > { %v7144_v1 = vsel %vm6706_vm7, %v1298_v45, %v1299_v47 }
  0xab   : > { %v3637_v43 = vrot.slane %v3635_v22, 4  ;;  %v7186_v7 = vrot.slane %v3644_v18, 5  ;;  %v3662_v22 = vshll.u32 %v5361_v24, 16  ;;  %v3672_v18 = vshrl.u32 %v5362_v39, 16 }
  0xad   : > { %5862 = vmatmul.mubr.msk.bf16.gmra.mrb[28].mxu0 %vm709_vm3, %v5276_v40  ;;  %v6324_v40 = vld [vmem:[%s6454_s27 + $0x2c] sm:$0x1]  ;;  %v3664_v27 = vrot.slane %v3662_v22, 5 }
  0xae   : > { %5710 = vmatmul.mubr.msk.bf16.gmra.mrb[12].mxu1 %vm709_vm3, %v5008_v60  ;;  %5867 = vmatprep.mubr.msk.bf16.mxu0 %vm709_vm3, %v6269_v20  ;;  %v1292_v28 = vrot.slane %v6324_v40, 5  ;;  %v1303_v60 = vrot.slane %v7012_v17, 5  ;;  %v6329_v40 = vld [vmem:[%s6454_s27 + $0x50] sm:$0x1]  ;;  %v6334_v17 = vld [vmem:[%s6454_s27 + $0x74] sm:$0x1] }
  0xaf   : > { %5713 = vmatprep.mubr.msk.bf16.mxu1 %vm709_vm3, %v5009_v44  ;;  %v5037_v44 = vrot.slane %v1219_v41, 9  ;;  %v5040_v41 = vrot.slane %v1222_v50, 9  ;;  %v1223_v50 = vld [vmem:[%s6454_s27 + $0x60] sm:$0xe]  ;;  %v5363_v20 = vld [vmem:[%s6454_s27 + $0x2c] sm:$0x1] }
  0xb0   : > { %v1305_v12 = vrot.slane %v1303_v60, 4  ;;  %v7157_v45 = vsel %vm6706_vm7, %v5038_v35, %v1303_v60  ;;  %v6330_v35 = vld [vmem:[%s6454_s27 + $0x5c] sm:$0x1] }
  0xb1   : > { %v7140_v2 = vsel %vm6706_vm7, %v5037_v44, %v1296_v10  ;;  %v1320_v55 = vrot.slane %v6330_v35, 5  ;;  %v1224_v35 = vld [vmem:[%s6454_s27 + $0x6c] sm:$0xe] }
  0xb2   : > { %v7161_v59 = vsel %vm6706_vm7, %v1305_v12, %v1306_v15  ;;  %v6331_v15 = vld [vmem:[%s6454_s27 + $0x64] sm:$0xf]  ;;  %v3650_v12 = vrot.slane %v3648_v21, 4  ;;  %v5042_v5 = vrot.slane %v1224_v35, 9 }
  0xb3   : > { %v6281_v21 = vld [vmem:[%s6454_s27 + $0x60] sm:$0xff]  }
  0xb5   : > { %5868 = vmatmul.mubr.msk.bf16.vlgmr.msra.gmra.mrb[0].mxu0 %vm709_vm3, %v6271_v62  ;;  %v6327_v62 = vld [vmem:[%s6454_s27 + $0x4c] sm:$0xf] }
  0xb6   : > { %5714 = vmatmul.mubr.msk.bf16.gmra.mrb[16].mxu1 %vm709_vm3, %v5010_v58  ;;  %5900 = vmatpush3.bf16.msra.mxu0 %v4117_v54  ;;  %v1310_v57 = vrot.slane %v6327_v62, 5  ;;  %v7135_v58 = vsel %vm6706_vm7, %v1291_v25, %v1292_v28  ;;  %v5039_v54 = vrot.slane %v1221_v31, 9  ;;  %v1313_v28 = vrot.slane %v6329_v40, 5 }
  0xb7   : > { %5717 = vmatprep.mubr.msk.bf16.mxu1 %vm709_vm3, %v5011_v61  ;;  %5871 = vmatprep.mubr.msk.bf16.mxu0 %vm709_vm3, %v6273_v11  ;;  %v6277_v61 = vld [vmem:[%s6454_s27 + $0x48] sm:$0xff]   ;;  %v6328_v11 = vld [vmem:[%s6454_s27 + $0x58] sm:$0xf]  ;;  %v1324_v62 = vrot.slane %v6331_v15, 5  ;;  %v5365_v15 = vld [vmem:[%s6454_s27 + $0x34] sm:$0xf] }
  0xb8   : > { %6234 = vmatprep.subr.msk.bf16.mxu0 %vm758_vm0, %v7085_v26  ;;  %v1317_v16 = vrot.slane %v6328_v11, 5  ;;  %v1312_v31 = vrot.slane %v1310_v57, 4  ;;  %v7165_v47 = vsel %vm6706_vm7, %v5039_v54, %v1310_v57  ;;  %v5360_v57 = vld [vmem:[%s6454_s27 + $0x20] sm:$0x1]  ;;  %v5364_v54 = vld [vmem:[%s6454_s27 + $0x30] sm:$0xf] }
  0xb9   : > { %v5041_v11 = vrot.slane %v1223_v50, 9  ;;  %v3686_v50 = vshll.u32 %v5364_v54, 16  ;;  %v3654_v25 = vshll.u32 %v5360_v57, 16  ;;  %v3692_v36 = vshll.u32 %v5365_v15, 16 }
  0xba   : > { %v7176_v60 = vsel %vm6706_vm7, %v5040_v41, %v1317_v16  ;;  %v7192_v41 = vsel %vm6706_vm7, %v1312_v31, %v1313_v28  ;;  %v1326_v31 = vrot.slane %v1324_v62, 4  ;;  %v3683_v28 = vshrl.u32 %v5364_v54, 16 }
  0xbb   : > { %v7234_v35 = vrot.slane %v3692_v36, 5 }
  0xbd   : > { %5872 = vmatmul.mubr.msk.bf16.gmra.mrb[4].mxu0 %vm709_vm3, %v6275_v37  ;;  %v1319_v37 = vrot.slane %v1317_v16, 4  ;;  %v6332_v16 = vld [vmem:[%s6454_s27 + $0x68] sm:$0x1] }
  0xbe   : > { %5718 = vmatmul.mubr.msk.bf16.gmra.mrb[20].mxu1 %vm709_vm3, %v5012_v6  ;;  %5875 = vmatprep.mubr.msk.bf16.mxu0 %vm709_vm3, %v6277_v61  ;;  %v3640_v6 = vrot.slane %v3638_v8, 5  ;;  %v6279_v61 = vld [vmem:[%s6454_s27 + $0x54] sm:$0xff]   ;;  %v1327_v40 = vrot.slane %v6332_v16, 5  ;;  %v3668_v8 = vshll.u32 %v5362_v39, 16  ;;  %v3651_v16 = vor.u32 %v3650_v12, %v7186_v7 }
  0xbf   : > { %5721 = vmatprep.mubr.msk.bf16.mxu1 %vm709_vm3, %v5013_v9  ;;  %v3659_v9 = vshrl.u32 %v5361_v24, 16  ;;  %v7201_v44 = vsel %vm6706_vm7, %v1319_v37, %v1320_v55  ;;  %v1334_v24 = vrot.slane %v6334_v17, 5  ;;  %v3696_v39 = vshrl.u32 %v5365_v15, 16 }
  0xc0   : > { %v3641_v10 = vor.u32 %v3640_v6, %v3637_v43  ;;  %v7207_v37 = vrot.slane %v3668_v8, 5  ;;  %v3674_v55 = vrot.slane %v3672_v18, 4  ;;  %v8239_v43 = vcombine.low %v6811_v52, %v6822_v46  ;;  %v6335_v8 = vld [vmem:[%s6454_s27 + $0x7c] sm:$0xf]  ;;  %v7243_v18 = vld [vmem:[%s6454_s27 + $0x38] sm:$0x1] }
  0xc1   : > { %v3661_v38 = vrot.slane %v3659_v9, 4  ;;  %v7216_v17 = vsel %vm6706_vm7, %v5041_v11, %v1324_v62  ;;  %v7220_v57 = vsel %vm6706_vm7, %v1326_v31, %v1327_v40  ;;  %v3685_v6 = vrot.slane %v3683_v28, 4  ;;  %8241 = vst [vmem:[#allocation6_spill] sm:$0xff] %v7243_v18 }
  0xc2   : > { %v3688_v12 = vrot.slane %v3686_v50, 5  ;;  %v8240_v52 = vcombine.low %v6843_v33, %v6848_v56  ;;  %v3642_v46 = vrot.slane %v3641_v10, 4  ;;  %v3652_v54 = vrot.slane %v3651_v16, 4  ;;  %v6283_v33 = vld [vmem:[%s6454_s27 + $0x6c] sm:$0xff]   ;;  %v1226_v16 = vld [vmem:[%s6454_s27 + $0x84] sm:$0xe] }
  0xc3   : > { %v3678_v62 = vshll.u32 %v5363_v20, 16  ;;  %v7228_v11 = vsel %vm6706_vm7, %v5042_v5, %v1331_v30  ;;  %v7232_v40 = vsel %vm6706_vm7, %v1333_v48, %v1334_v24  ;;  %v3698_v9 = vrot.slane %v3696_v39, 4  ;;  %v6284_v48 = vld [vmem:[%s6454_s27 + $0x78] sm:$0xff]  }
  0xc4   : > { %v3665_v10 = vor.u32 %v3664_v27, %v3661_v38  ;;  %v3675_v20 = vor.u32 %v3674_v55, %v7207_v37  ;;  %v1338_v30 = vrot.slane %v6335_v8, 5  ;;  %v3689_v38 = vor.u32 %v3688_v12, %v3685_v6  ;;  %v5367_v5 = vld [vmem:[%s6454_s27 + $0x3c] sm:$0xf] }
  0xc5   : > { %5876 = vmatmul.mubr.msk.bf16.gmra.mrb[8].mxu0 %vm709_vm3, %v6279_v61  ;;  %v3656_v61 = vrot.slane %v3654_v25, 5  ;;  %v1225_v25 = vld [vmem:[%s6454_s27 + $0x78] sm:$0xe]  ;;  %v7259_v50 = vrot.slane %v3678_v62, 5  ;;  %v3699_v39 = vor.u32 %v3698_v9, %v7234_v35  ;;  %v3702_v55 = vshll.u32 %v7243_v18, 16 }
  0xc6   : > { %5722 = vmatmul.mubr.msk.bf16.gmra.mrb[24].mxu1 %vm709_vm3, %v8239_v43  ;;  %5879 = vmatprep.mubr.msk.bf16.mxu0 %vm709_vm3, %v6281_v21  ;;  %v3647_v21 = vsel %vm6480_vm4, %v3642_v46, %v7186_v7  ;;  %v5043_v24 = vrot.slane %v1225_v25, 9  ;;  %v6336_v43 = vld [vmem:[%s6454_s27 + $0x88] sm:$0xf]  ;;  %v7267_v7 = vld [vmem:[%s6454_s27 + $0x40] sm:$0xf]  ;;  %v3666_v12 = vrot.slane %v3665_v10, 4  ;;  %v8243_v62 = vcombine.low %v6863_v14, %v6872_v42 }
  0xc7   : > { %5725 = vmatprep.mubr.msk.bf16.mxu1 %vm709_vm3, %v8240_v52  ;;  %v3657_v31 = vsel %vm6480_vm4, %v3652_v54, %v3656_v61  ;;  %v1345_v6 = vrot.slane %v6336_v43, 5  ;;  %8242 = vst [vmem:[#allocation7_spill] sm:$0xff] %v7267_v7  ;;  %v3676_v52 = vrot.slane %v3675_v20, 4  ;;  %v1340_v46 = vrot.slane %v1338_v30, 4  ;;  %v6337_v54 = vld [vmem:[%s6454_s27 + $0x80] sm:$0x1] }
  0xc8   : > { %v1341_v61 = vrot.slane %v6337_v54, 5  ;;  %v3690_v9 = vrot.slane %v3689_v38, 4  ;;  %v5044_v25 = vrot.slane %v1226_v16, 9  ;;  %v3707_v8 = vshrl.u32 %v5367_v5, 16  ;;  %v6285_v10 = vld [vmem:[%s6454_s27 + $0x84] sm:$0xff]  }
  0xc9   : > { %v3710_v43 = vshll.u32 %v5367_v5, 16  ;;  %v7281_v20 = vcombine.low %v3647_v21, %v3657_v31  ;;  %v7285_v14 = vsel %vm758_vm0, %v7085_v26, 0  ;;  %v3720_v38 = vshrl.u32 %v7267_v7, 16  ;;  %v6286_v21 = vld [vmem:[%s6454_s27 + $0x90] sm:$0xff]   ;;  %v6342_v18 = vld [vmem:[%s6454_s27 + $0xa0] sm:$0xf] }
  0xca   : > { %v3700_v16 = vrot.slane %v3699_v39, 4  ;;  %v3704_v5 = vrot.slane %v3702_v55, 5  ;;  %v1347_v54 = vrot.slane %v1345_v6, 4  ;;  %v3671_v31 = vsel %vm6480_vm4, %v3666_v12, %v7207_v37 }
  0xcb   : > { %v3681_v26 = vsel %vm6480_vm4, %v3676_v52, %v7259_v50  ;;  %v7300_v39 = vsel %vm6706_vm7, %v5043_v24, %v1338_v30  ;;  %v7304_v55 = vsel %vm6706_vm7, %v1340_v46, %v1341_v61  ;;  %v3695_v37 = vsel %vm6480_vm4, %v3690_v9, %v7234_v35  ;;  %v5373_v30 = vld [vmem:[%s6454_s27 + $0x54] sm:$0xf]  ;;  %v7321_v24 = vld [vmem:[%s6454_s27 + $0x58] sm:$0xf]  ;;  %v7326_v61 = vld [vmem:[%s6454_s27 + $0x90] sm:$0xe] }
  0xcc   : > { %v7317_v12 = vsel %vm6706_vm7, %v5044_v25, %v1345_v6  ;;  %v3709_v50 = vrot.slane %v3707_v8, 4  ;;  %v3712_v52 = vrot.slane %v3710_v43, 5  ;;  %v3722_v46 = vrot.slane %v3720_v38, 4 }
  0xcd   : > { %5880 = vmatmul.mubr.msk.bf16.gmra.mrb[12].mxu0 %vm709_vm3, %v6283_v33  ;;  %v8244_v33 = vcombine.low %v7070_v0, %v7089_v23  ;;  %v6338_v0 = vld [vmem:[%s6454_s27 + $0x8c] sm:$0x1]  ;;  %v3705_v36 = vsel %vm6480_vm4, %v3700_v16, %v3704_v5  ;;  %v3755_v25 = vshrl.u32 %v5373_v30, 16  ;;  %v3758_v8 = vshll.u32 %v5373_v30, 16 }
  0xce   : > { %5726 = vmatmul.mubr.msk.bf16.gmra.mrb[28].mxu1 %vm709_vm3, %v8243_v62  ;;  %5883 = vmatprep.mubr.msk.bf16.mxu0 %vm709_vm3, %v6284_v48  ;;  %v3716_v48 = vshll.u32 %v7267_v7, 16  ;;  %v1348_v23 = vrot.slane %v6338_v0, 5  ;;  %v5370_v62 = vld [vmem:[%s6454_s27 + $0x48] sm:$0xf]  ;;  %v7310_v0 = vld [vmem:[%s6454_s27 + $0x4c] sm:$0xf]  ;;  %v8246_v38 = vcombine.low %v7074_v29, %v7078_v53  ;;  %v7344_v16 = vcombine.low %v3671_v31, %v3681_v26 }
  0xcf   : > { %5731 = vmatprep.mubr.msk.bf16.mxu1 %vm709_vm3, %v8244_v33  ;;  %v7307_v33 = vld [vmem:[%s6454_s27 + $0x44] sm:$0x1]  ;;  %v3731_v27 = vshrl.u32 %v5370_v62, 16  ;;  %v3734_v15 = vshll.u32 %v5370_v62, 16  ;;  %v3740_v6 = vshll.u32 %v7310_v0, 16  ;;  %v3744_v9 = vshrl.u32 %v7310_v0, 16 }
  0xd0   : > { %8245 = vst [vmem:[#allocation8_spill] sm:$0xff] %v7307_v33  ;;  %v7323_v28 = vrot.slane %v3716_v48, 5  ;;  %v7332_v35 = vsel %vm6706_vm7, %v1347_v54, %v1348_v23  ;;  %v3764_v43 = vshll.u32 %v7321_v24, 16  ;;  %v3768_v48 = vshrl.u32 %v7321_v24, 16  ;;  %v5376_v31 = vld [vmem:[%s6454_s27 + $0x60] sm:$0xf] }
  0xd1   : > { %v3726_v5 = vshll.u32 %v7307_v33, 16  ;;  %v5045_v54 = vrot.slane %v7326_v61, 9  ;;  %v8247_v23 = vcombine.low %v7115_v34, %v7131_v4  ;;  %v7355_v29 = vcombine.low %v3695_v37, %v3705_v36  ;;  %v6287_v26 = vld [vmem:[%s6454_s27 + $0x9c] sm:$0xff]   ;;  %v6288_v30 = vld [vmem:[%s6454_s27 + $0xa8] sm:$0xff]  }
  0xd2   : > { %v3713_v53 = vor.u32 %v3712_v52, %v3709_v50  ;;  %v3733_v62 = vrot.slane %v3731_v27, 4  ;;  %v7366_v34 = vrot.slane %v3740_v6, 5  ;;  %v3746_v4 = vrot.slane %v3744_v9, 4  ;;  %v6339_v36 = vld [vmem:[%s8215_s1 + $0x8] sm:$0x3] }
  0xd3   : > { %v3757_v27 = vrot.slane %v3755_v25, 4  ;;  %v3760_v37 = vrot.slane %v3758_v8, 5  ;;  %v7375_v50 = vrot.slane %v3764_v43, 5  ;;  %v3770_v52 = vrot.slane %v3768_v48, 4  ;;  %v6340_v6 = vld [vmem:[%s6454_s27 + $0x94] sm:$0xf] }
  0xd4   : > { %v7381_v9 = vld [vmem:[%s6454_s27 + $0x64] sm:$0xf]  ;;  %v3779_v61 = vshrl.u32 %v5376_v31, 16  ;;  %v7383_v22 = vrot.slane %v3713_v53, 4  ;;  %v1359_v25 = vrot.slane %v6342_v18, 5  ;;  %v3747_v43 = vor.u32 %v3746_v4, %v7366_v34 }
  0xd5   : > { %5884 = vmatmul.mubr.msk.bf16.gmra.mrb[16].mxu0 %vm709_vm3, %v6285_v10  ;;  %8248 = vst [vmem:[#allocation9_spill] sm:$0xff] %v7381_v9  ;;  %v3782_v10 = vshll.u32 %v5376_v31, 16  ;;  %v3761_v31 = vor.u32 %v3760_v37, %v3757_v27  ;;  %v3771_v53 = vor.u32 %v3770_v52, %v7375_v50  ;;  %v8249_v18 = vcombine.low %v7122_v19, %v7135_v58  ;;  %v6289_v37 = vld [vmem:[%s6454_s27 + $0xb4] sm:$0xff]  }
  0xd6   : > { %5732 = vmatmul.mubr.msk.bf16.vlgmr.msra.gmra.mrb[0].mxu1 %vm709_vm3, %v8246_v38  ;;  %5887 = vmatprep.mubr.msk.bf16.mxu0 %vm709_vm3, %v6286_v21  ;;  %v3736_v21 = vrot.slane %v3734_v15, 5  ;;  %v7364_v38 = vld [vmem:[%s6454_s27 + $0x50] sm:$0x1]  ;;  %v7373_v15 = vld [vmem:[%s6454_s27 + $0x5c] sm:$0x1]  ;;  %v8250_v27 = vcombine.low %v7140_v2, %v7144_v1  ;;  %v1361_v52 = vrot.slane %v1359_v25, 4 }
  0xd7   : > { %5764 = vmatpush3.bf16.msra.mxu1 %v7111_v49  ;;  %5735 = vmatprep.mubr.msk.bf16.mxu1 %vm709_vm3, %v8247_v23  ;;  %v3723_v49 = vor.u32 %v3722_v46, %v7323_v28  ;;  %v7377_v46 = vrot.slane %v3726_v5, 5  ;;  %v1352_v23 = vrot.slane %v6340_v6, 5  ;;  %v3750_v48 = vshll.u32 %v7364_v38, 16  ;;  %v1228_v5 = vld [vmem:[%s6454_s27 + $0x9c] sm:$0xe] }
  0xd8   : > { %6230 = vmatprep.subr.msk.bf16.mxu1 %vm758_vm0, %v6339_v36  ;;  %v6341_v36 = vld [vmem:[%s6454_s27 + $0x98] sm:$0x1]  ;;  %v3737_v7 = vor.u32 %v3736_v21, %v3733_v62  ;;  %v3774_v6 = vshll.u32 %v7373_v15, 16  ;;  %v3792_v62 = vshrl.u32 %v7381_v9, 16  ;;  %v3784_v4 = vrot.slane %v3782_v10, 5 }
  0xd9   : > { %v1355_v33 = vrot.slane %v6341_v36, 5  ;;  %v3724_v8 = vrot.slane %v3723_v49, 4  ;;  %v3788_v36 = vshll.u32 %v7381_v9, 16  ;;  %v7402_v21 = vsel %vm6706_vm7, %v5045_v54, %v1352_v23  ;;  %v7413_v2 = vld [vmem:[%s6454_s27 + $0x68] sm:$0x1] }
  0xda   : > { %v3781_v49 = vrot.slane %v3779_v61, 4  ;;  %v3738_v19 = vrot.slane %v3737_v7, 4  ;;  %v5046_v58 = vrot.slane %v1228_v5, 9  ;;  %v3748_v3 = vrot.slane %v3747_v43, 4  ;;  %8251 = vst [vmem:[#allocation10_spill] sm:$0xff] %v7413_v2  ;;  %v6290_v5 = vld [vmem:[%s6454_s27 + $0xc0] sm:$0xff]  }
  0xdb   : > { %v3752_v54 = vrot.slane %v3750_v48, 5  ;;  %v3776_v63 = vrot.slane %v3774_v6, 5  ;;  %v1366_v61 = vrot.slane %v6848_v56, 5  ;;  %v3762_v10 = vrot.slane %v3761_v31, 4  ;;  %v1230_v31 = vld [vmem:[%s6454_s27 + $0xb4] sm:$0xe] }
  0xdc   : > { %v3772_v51 = vrot.slane %v3771_v53, 4  ;;  %v7415_v1 = vrot.slane %v3788_v36, 5  ;;  %v3794_v7 = vrot.slane %v3792_v62, 4  ;;  %v3719_v43 = vsel %vm6480_vm4, %v7383_v22, %v7323_v28  ;;  %v6344_v62 = vld [vmem:[%s6454_s27 + $0xb0] sm:$0x1] }
  0xdd   : > { %5888 = vmatmul.mubr.msk.bf16.gmra.mrb[20].mxu0 %vm709_vm3, %v6287_v26  ;;  %v1354_v26 = vrot.slane %v1352_v23, 4  ;;  %v1229_v23 = vld [vmem:[%s6454_s27 + $0xa8] sm:$0xe]  ;;  %v3729_v48 = vsel %vm6480_vm4, %v3724_v8, %v7377_v46  ;;  %v3785_v6 = vor.u32 %v3784_v4, %v3781_v49  ;;  %v3743_v53 = vsel %vm6480_vm4, %v3738_v19, %v7366_v34  ;;  %v5379_v46 = vld [vmem:[%s6454_s27 + $0x6c] sm:$0xf] }
  0xde   : > { %5736 = vmatmul.mubr.msk.bf16.gmra.mrb[4].mxu1 %vm709_vm3, %v8249_v18  ;;  %5891 = vmatprep.mubr.msk.bf16.mxu0 %vm709_vm3, %v6288_v30  ;;  %v6343_v18 = vld [vmem:[%s6454_s27 + $0xa4] sm:$0x1]  ;;  %v7435_v36 = vsel %vm6706_vm7, %v5046_v58, %v1359_v25  ;;  %v5047_v28 = vrot.slane %v1229_v23, 9  ;;  %v1368_v8 = vrot.slane %v1366_v61, 4  ;;  %v3798_v49 = vshll.u32 %v7413_v2, 16 }
  0xdf   : > { %5739 = vmatprep.mubr.msk.bf16.mxu1 %vm709_vm3, %v8250_v27  ;;  %v1362_v30 = vrot.slane %v6343_v18, 5  ;;  %v7427_v56 = vsel %vm6706_vm7, %v1354_v26, %v1355_v33  ;;  %v3753_v33 = vsel %vm6480_vm4, %v3748_v3, %v3752_v54  ;;  %v1369_v26 = vrot.slane %v6344_v62, 5  ;;  %v5382_v18 = vld [vmem:[%s6454_s27 + $0x78] sm:$0xf]  ;;  %v7490_v54 = vld [vmem:[%s6454_s27 + $0xbc] sm:$0x1] }
  0xe0   : > { %v3767_v34 = vsel %vm6480_vm4, %v3762_v10, %v7375_v50  ;;  %v3777_v25 = vsel %vm6480_vm4, %v3772_v51, %v3776_v63  ;;  %v3795_v4 = vor.u32 %v3794_v7, %v7415_v1  ;;  %v5048_v27 = vrot.slane %v1230_v31, 9  ;;  %v7464_v51 = vld [vmem:[%s6454_s27 + $0x70] sm:$0xf]  ;;  %v7494_v10 = vld [vmem:[%s6454_s27 + $0x7c] sm:$0xf] }
  0xe1   : > { %v7439_v22 = vsel %vm6706_vm7, %v1361_v52, %v1362_v30  ;;  %v8253_v3 = vcombine.low %v7157_v45, %v7161_v59  ;;  %v7460_v19 = vrot.slane %v3785_v6, 4  ;;  %v1373_v50 = vrot.slane %v6872_v42, 5  ;;  %8254 = vst [vmem:[#allocation12_spill] sm:$0xff] %v7464_v51  ;;  %8256 = vst [vmem:[#allocation13_spill] sm:$0xff] %v7494_v10  ;;  %v5385_v7 = vld [vmem:[%s6454_s27 + $0x84] sm:$0xf] }
  0xe2   : > { %8252 = vst [vmem:[#allocation11_spill] sm:$0xff] %v7439_v22  ;;  %v3803_v63 = vshrl.u32 %v5379_v46, 16  ;;  %v8255_v45 = vcombine.low %v7165_v47, %v7192_v41  ;;  %v7472_v58 = vcombine.low %v3743_v53, %v3753_v33  ;;  %v7478_v42 = vsel %vm6706_vm7, %v5047_v28, %v1366_v61  ;;  %v6291_v61 = vld [vmem:[%s6454_s27 + $0xcc] sm:$0xff]   ;;  %v7506_v31 = vld [vmem:[%s6454_s27 + $0x88] sm:$0xf] }
  0xe3   : > { %v7481_v30 = vcombine.low %v3767_v34, %v3777_v25  ;;  %v7485_v47 = vsel %vm6706_vm7, %v1368_v8, %v1369_v26  ;;  %v7487_v41 = vrot.slane %v3798_v49, 5  ;;  %v3812_v6 = vshll.u32 %v7464_v51, 16  ;;  %8257 = vst [vmem:[#allocation14_spill] sm:$0xff] %v7506_v31  ;;  %v5388_v62 = vld [vmem:[%s6454_s27 + $0x90] sm:$0xf] }
  0xe4   : > { %v7512_v28 = vrot.slane %v1373_v50, 4  ;;  %v7514_v33 = vrot.slane %v3803_v63, 4  ;;  %v3816_v8 = vshrl.u32 %v7464_v51, 16  ;;  %v3827_v26 = vshrl.u32 %v5382_v18, 16  ;;  %v7521_v25 = vld [vmem:[%s6454_s27 + $0x94] sm:$0xf] }
  0xe5   : > { %5892 = vmatmul.mubr.msk.bf16.gmra.mrb[24].mxu0 %vm709_vm3, %v6289_v37  ;;  %v7458_v37 = vcombine.low %v3719_v43, %v3729_v48  ;;  %v7502_v43 = vsel %vm6706_vm7, %v5048_v27, %v1373_v50  ;;  %v3806_v48 = vshll.u32 %v5379_v46, 16  ;;  %v3830_v49 = vshll.u32 %v5382_v18, 16  ;;  %8258 = vst [vmem:[#allocation15_spill] sm:$0xff] %v7521_v25  ;;  %v7559_v2 = vld [vmem:[%s6454_s27 + $0x8c] sm:$0x1] }
  0xe6   : > { %5740 = vmatmul.mubr.msk.bf16.gmra.mrb[8].mxu1 %vm709_vm3, %v8253_v3  ;;  %5895 = vmatprep.mubr.msk.bf16.mxu0 %vm709_vm3, %v6290_v5  ;;  %v7498_v5 = vrot.slane %v3795_v4, 4  ;;  %v3836_v46 = vshll.u32 %v7494_v10, 16  ;;  %v3840_v34 = vshrl.u32 %v7494_v10, 16  ;;  %v3851_v4 = vshrl.u32 %v5385_v7, 16 }
  0xe7   : > { %5743 = vmatprep.mubr.msk.bf16.mxu1 %vm709_vm3, %v8255_v45  ;;  %v3854_v27 = vshll.u32 %v5385_v7, 16  ;;  %v3860_v3 = vshll.u32 %v7506_v31, 16  ;;  %v3864_v50 = vshrl.u32 %v7506_v31, 16  ;;  %v7531_v45 = vld [vmem:[%s6454_s27 + $0x74] sm:$0x1]  ;;  %v3808_v18 = vrot.slane %v3806_v48, 5 }
  0xe8   : > { %v3875_v52 = vshrl.u32 %v5388_v62, 16  ;;  %v3878_v53 = vshll.u32 %v5388_v62, 16  ;;  %v8259_v7 = vcombine.low %v7176_v60, %v7201_v44  ;;  %v3818_v59 = vrot.slane %v3816_v8, 4  ;;  %v5391_v48 = vld [vmem:[%s6454_s27 + $0x9c] sm:$0xf] }
  0xe9   : > { %v3884_v63 = vshll.u32 %v7521_v25, 16  ;;  %v3888_v23 = vshrl.u32 %v7521_v25, 16  ;;  %v8260_v62 = vcombine.low %v7216_v17, %v7220_v57  ;;  %v7549_v44 = vld [vmem:[%s6454_s27 + $0x80] sm:$0x1]  ;;  %v3829_v60 = vrot.slane %v3827_v26, 4 }
  0xea   : > { %8261 = vst [vmem:[#allocation16_spill] sm:$0xff] %v7549_v44  ;;  %v3853_v31 = vrot.slane %v3851_v4, 4  ;;  %v3856_v8 = vrot.slane %v3854_v27, 5  ;;  %v7553_v10 = vrot.slane %v3860_v3, 5  ;;  %v3866_v51 = vrot.slane %v3864_v50, 4 }
  0xeb   : > { %v7556_v25 = vld [vmem:[%s6454_s27 + $0xa0] sm:$0xf]  ;;  %v3877_v17 = vrot.slane %v3875_v52, 4  ;;  %v3880_v57 = vrot.slane %v3878_v53, 5  ;;  %v3902_v9 = vshll.u32 %v5391_v48, 16  ;;  %v3809_v26 = vor.u32 %v3808_v18, %v7514_v33 }
  0xec   : > { %v3846_v27 = vshll.u32 %v7549_v44, 16  ;;  %v7568_v3 = vld [vmem:[%s6454_s27 + $0x98] sm:$0x1]  ;;  %v3908_v50 = vshll.u32 %v7556_v25, 16  ;;  %v3912_v52 = vshrl.u32 %v7556_v25, 16  ;;  %v3857_v22 = vor.u32 %v3856_v8, %v3853_v31 }
  0xed   : > { %5896 = vmatmul.mubr.msk.bf16.gmra.mrb[28].mxu0 %vm709_vm3, %v6291_v61  ;;  %v7539_v61 = vrot.slane %v3812_v6, 5  ;;  %v3842_v6 = vrot.slane %v3840_v34, 4  ;;  %v3890_v34 = vrot.slane %v3888_v23, 4  ;;  %v3870_v33 = vshll.u32 %v7559_v2, 16 }
  0xee   : > { %5744 = vmatmul.mubr.msk.bf16.gmra.mrb[12].mxu1 %vm709_vm3, %v8259_v7  ;;  %5901 = vmatprep.mubr.msk.bf16.mxu0 %vm709_vm3, %v7281_v20  ;;  %v3832_v7 = vrot.slane %v3830_v49, 5  ;;  %v7551_v20 = vrot.slane %v3836_v46, 5  ;;  %v3822_v49 = vshll.u32 %v7531_v45, 16  ;;  %v7563_v46 = vrot.slane %v3884_v63, 5 }
  0xef   : > { %5747 = vmatprep.mubr.msk.bf16.mxu1 %vm709_vm3, %v8260_v62  ;;  %v3899_v62 = vshrl.u32 %v5391_v48, 16  ;;  %v3819_v4 = vor.u32 %v3818_v59, %v7539_v61  ;;  %v3867_v23 = vor.u32 %v3866_v51, %v7553_v10  ;;  %v3881_v59 = vor.u32 %v3880_v57, %v3877_v17  ;;  %v7601_v57 = vld [vmem:[%s6454_s27 + $0xa4] sm:$0x1] }
  0xf0   : > { %v3833_v53 = vor.u32 %v3832_v7, %v3829_v60  ;;  %v3843_v48 = vor.u32 %v3842_v6, %v7551_v20  ;;  %v3904_v18 = vrot.slane %v3902_v9, 5  ;;  %v8262_v44 = vcombine.low %v7228_v11, %v7232_v40 }
  0xf1   : > { %v3901_v63 = vrot.slane %v3899_v62, 4  ;;  %v8263_v31 = vrot.slane %v7490_v54, 5  ;;  %v3824_v51 = vrot.slane %v3822_v49, 5  ;;  %v3891_v60 = vor.u32 %v3890_v34, %v7563_v46  ;;  %v7604_v34 = vld [vmem:[%s6454_s27 + $0xac] sm:$0xf] }
  0xf2   : > { %v3894_v9 = vshll.u32 %v7568_v3, 16  ;;  %v8264_v11 = vcombine.low %v7300_v39, %v7304_v55  ;;  %v3810_v40 = vrot.slane %v3809_v26, 4  ;;  %v7597_v54 = vrot.slane %v3908_v50, 5 }
  0xf3   : > { %v3834_v7 = vrot.slane %v3833_v53, 4  ;;  %v3844_v6 = vrot.slane %v3843_v48, 4  ;;  %v3848_v8 = vrot.slane %v3846_v27, 5  ;;  %v3872_v17 = vrot.slane %v3870_v33, 5  ;;  %v7614_v48 = vld [vmem:[%s6454_s27 + $0xb0] sm:$0x1] }
  0xf4   : > { %v3858_v39 = vrot.slane %v3857_v22, 4  ;;  %v3868_v55 = vrot.slane %v3867_v23, 4  ;;  %v3882_v62 = vrot.slane %v3881_v59, 4  ;;  %v3905_v49 = vor.u32 %v3904_v18, %v3901_v63 }
  0xf5   : > { %5902 = vmatmul.mubr.msk.bf16.vlgmr.msra.gmra.mrb[0].mxu0 %vm709_vm3, %v7344_v16  ;;  %v7587_v16 = vsel %vm6706_vm7, %v7512_v28, %v8263_v31  ;;  %v3914_v28 = vrot.slane %v3912_v52, 4  ;;  %v3896_v26 = vrot.slane %v3894_v9, 5  ;;  %v3815_v52 = vsel %vm6480_vm4, %v3810_v40, %v7539_v61 }
  0xf6   : > { %5748 = vmatmul.mubr.msk.bf16.gmra.mrb[16].mxu1 %vm709_vm3, %v8262_v44  ;;  %5934 = vmatpush3.bf16.msra.mxu0 %v7285_v14  ;;  %v3820_v14 = vrot.slane %v3819_v4, 4  ;;  %v5394_v44 = vld [vmem:[%s6454_s27 + $0xa8] sm:$0xf]  ;;  %v3918_v22 = vshll.u32 %v7601_v57, 16  ;;  %v3839_v33 = vsel %vm6480_vm4, %v3834_v7, %v7551_v20  ;;  %v3849_v23 = vsel %vm6480_vm4, %v3844_v6, %v3848_v8 }
  0xf7   : > { %5751 = vmatprep.mubr.msk.bf16.mxu1 %vm709_vm3, %v8264_v11  ;;  %5905 = vmatprep.mubr.msk.bf16.mxu0 %vm709_vm3, %v7355_v29  ;;  %v3892_v29 = vrot.slane %v3891_v60, 4  ;;  %v3923_v4 = vshrl.u32 %v5394_v44, 16  ;;  %v3926_v50 = vshll.u32 %v5394_v44, 16  ;;  %v3915_v53 = vor.u32 %v3914_v28, %v7597_v54  ;;  %v5443_v11 = vld [vmem:[%s6454_s27 + $0x48] sm:$0xe] }
  0xf8   : > { %v3825_v27 = vsel %vm6480_vm4, %v3820_v14, %v3824_v51  ;;  %v3932_v59 = vshll.u32 %v7604_v34, 16  ;;  %v3936_v61 = vshrl.u32 %v7604_v34, 16  ;;  %v3863_v63 = vsel %vm6480_vm4, %v3858_v39, %v7553_v10  ;;  %v7679_v39 = vld [vmem:[%s6454_s27 + $0xb8] sm:$0xf] }
  0xf9   : > { %v3873_v18 = vsel %vm6480_vm4, %v3868_v55, %v3872_v17  ;;  %v3887_v20 = vsel %vm6480_vm4, %v3882_v62, %v7563_v46  ;;  %v3906_v31 = vrot.slane %v3905_v49, 4  ;;  %v8265_v51 = vcombine.low %v7317_v12, %v7332_v35 }
  0xfa   : > { %v3925_v10 = vrot.slane %v3923_v4, 4  ;;  %v3928_v60 = vrot.slane %v3926_v50, 5  ;;  %v3942_v9 = vshll.u32 %v7614_v48, 16  ;;  %v8266_v46 = vcombine.low %v7402_v21, %v7427_v56  ;;  %v5397_v21 = vld [vmem:[%s6454_s27 + $0xb4] sm:$0xf] }
  0xfb   : > { %v5064_v12 = vcombine.low %v7478_v42, %v7485_v47  ;;  %v8267_v35 = vsel %vm6480_vm4, %v7498_v5, %v7487_v41  ;;  %v3916_v14 = vrot.slane %v3915_v53, 4  ;;  %v3920_v28 = vrot.slane %v3918_v22, 5  ;;  %v5445_v4 = vld [vmem:[%s6454_s27 + $0x60] sm:$0xe]  ;;  %v5446_v53 = vld [vmem:[%s6454_s27 + $0x6c] sm:$0xe] }
  0xfc   : > { %v5065_v56 = vcombine.low %v7502_v43, %v7587_v16  ;;  %v7662_v44 = vcombine.low %v3815_v52, %v3825_v27  ;;  %v7664_v42 = vrot.slane %v3932_v59, 5  ;;  %v3938_v47 = vrot.slane %v3936_v61, 4  ;;  %v8276_v16 = vld [vmem:[#allocation4_spill] sm:$0xff] }
  0xfd   : > { %5906 = vmatmul.mubr.msk.bf16.gmra.mrb[4].mxu0 %vm709_vm3, %v7458_v37  ;;  %v3897_v37 = vsel %vm6480_vm4, %v3892_v29, %v3896_v26  ;;  %v7666_v41 = vcombine.low %v3839_v33, %v3849_v23  ;;  %v7668_v5 = vcombine.low %v3863_v63, %v3873_v18  ;;  %v3911_v6 = vsel %vm6480_vm4, %v3906_v31, %v7597_v54  ;;  %v8269_v23 = vld [vmem:[#allocation11_spill] sm:$0xff]  ;;  %v5400_v63 = vld [vmem:[%s6454_s27 + $0xc0] sm:$0xf]  ;;  %v8271_v18 = vld [vmem:[#allocation9_spill] sm:$0xff] }
  0xfe   : > { %5752 = vmatmul.mubr.msk.bf16.gmra.mrb[20].mxu1 %vm709_vm3, %v8265_v51  ;;  %5909 = vmatprep.mubr.msk.bf16.mxu0 %vm709_vm3, %v7472_v58  ;;  %v8268_v58 = vsel %vm6480_vm4, %v7460_v19, %v7415_v1  ;;  %v7670_v7 = vcombine.low %v3887_v20, %v3897_v37  ;;  %v5459_v1 = vrot.slane %v5443_v11, 9  ;;  %v5444_v19 = vld [vmem:[%s6454_s27 + $0x54] sm:$0xe]  ;;  %v3929_v8 = vor.u32 %v3928_v60, %v3925_v10  ;;  %v8272_v31 = vld [vmem:[#allocation10_spill] sm:$0xff] }
  0xff   : > { %5755 = vmatprep.mubr.msk.bf16.mxu1 %vm709_vm3, %v8266_v46  ;;  %v5413_v40 = vcombine.low %v8268_v58, %v8267_v35  ;;  %v7676_v17 = vrot.slane %v3942_v9, 5  ;;  %v3947_v55 = vshrl.u32 %v5397_v21, 16  ;;  %v3921_v62 = vsel %vm6480_vm4, %v3916_v14, %v3920_v28  ;;  %v8273_v9 = vld [vmem:[#allocation12_spill] sm:$0xff]  ;;  %v7728_v35 = vld [vmem:[%s6454_s27 + $0xbc] sm:$0x1] }
 0x100   : > { %v3950_v49 = vshll.u32 %v5397_v21, 16  ;;  %v4406_v29 = vrot.slane %v7310_v0, 5  ;;  %v4409_v26 = vrot.slane %v7364_v38, 5  ;;  %v3939_v50 = vor.u32 %v3938_v47, %v7664_v42  ;;  %v7731_v58 = vld [vmem:[%s6454_s27 + $0xc4] sm:$0xf] }
 0x101   : > { %v5460_v52 = vrot.slane %v5444_v19, 9  ;;  %v4413_v54 = vrot.slane %v7321_v24, 5  ;;  %v4416_v27 = vrot.slane %v7373_v15, 5  ;;  %v3956_v22 = vshll.u32 %v7679_v39, 16  ;;  %v5447_v19 = vld [vmem:[%s6454_s27 + $0x78] sm:$0xe] }
 0x102   : > { %v3960_v33 = vshrl.u32 %v7679_v39, 16  ;;  %v7696_v0 = vsel %vm6706_vm7, %v5459_v1, %v4406_v29  ;;  %v4408_v38 = vrot.slane %v4406_v29, 4  ;;  %v8270_v59 = vcombine.low %v7435_v36, %v8269_v23  ;;  %v8274_v23 = vld [vmem:[#allocation13_spill] sm:$0xff] }
 0x103   : > { %v7703_v24 = vcombine.low %v3911_v6, %v3921_v62  ;;  %v7707_v15 = vsel %vm6706_vm7, %v5460_v52, %v4413_v54  ;;  %v5461_v61 = vrot.slane %v5445_v4, 9  ;;  %v4420_v20 = vrot.slane %v8271_v18, 5  ;;  %v6292_v6 = vld [vmem:[%s6454_s27 + $0xc] sm:$0xff]  }
 0x104   : > { %v7713_v36 = vsel %vm6706_vm7, %v4408_v38, %v4409_v26  ;;  %v4423_v51 = vrot.slane %v8272_v31, 5  ;;  %v5462_v37 = vrot.slane %v5446_v53, 9  ;;  %v4427_v11 = vrot.slane %v8273_v9, 5 }
 0x105   : > { %5910 = vmatmul.mubr.msk.bf16.gmra.mrb[8].mxu0 %vm709_vm3, %v7481_v30  ;;  %v4415_v30 = vrot.slane %v4413_v54, 4  ;;  %v5476_v10 = vcombine.low %v7696_v0, %v7713_v36  ;;  %v4430_v46 = vrot.slane %v7531_v45, 5  ;;  %v7737_v14 = vsel %vm6706_vm7, %v5461_v61, %v4420_v20 }
 0x106   : > { %5756 = vmatmul.mubr.msk.bf16.gmra.mrb[24].mxu1 %vm709_vm3, %v8270_v59  ;;  %5913 = vmatprep.mubr.msk.bf16.mxu0 %vm709_vm3, %v5413_v40  ;;  %v4422_v28 = vrot.slane %v4420_v20, 4  ;;  %v7739_v21 = vrot.slane %v3947_v55, 4  ;;  %v3971_v47 = vshrl.u32 %v5400_v63, 16  ;;  %v7743_v45 = vsel %vm6706_vm7, %v5462_v37, %v4427_v11  ;;  %v5174_v55 = vld [vmem:[%s6454_s27 + $0x78] sm:$0xf]  ;;  %v8275_v59 = vld [vmem:[#allocation16_spill] sm:$0xff] }
 0x107   : > { %5759 = vmatprep.mubr.msk.bf16.mxu1 %vm709_vm3, %v5064_v12  ;;  %v7721_v60 = vsel %vm6706_vm7, %v4415_v30, %v4416_v27  ;;  %v7725_v12 = vrot.slane %v3929_v8, 4  ;;  %v4429_v1 = vrot.slane %v4427_v11, 4  ;;  %v7747_v8 = vrot.slane %v3939_v50, 4 }
 0x108   : > { %v5477_v40 = vcombine.low %v7707_v15, %v7721_v60  ;;  %v7749_v62 = vrot.slane %v3950_v49, 5  ;;  %v3974_v29 = vshll.u32 %v5400_v63, 16  ;;  %v7753_v26 = vsel %vm6706_vm7, %v4422_v28, %v4423_v51  ;;  %v8278_v28 = vld [vmem:[#allocation14_spill] sm:$0xff] }
 0x109   : > { %v7756_v4 = vrot.slane %v3956_v22, 5  ;;  %v7758_v52 = vrot.slane %v3960_v33, 4  ;;  %v5478_v54 = vcombine.low %v7737_v14, %v7753_v26  ;;  %v7764_v27 = vsel %vm6706_vm7, %v4429_v1, %v4430_v46  ;;  %v5448_v33 = vld [vmem:[%s6454_s27 + $0x84] sm:$0xe]  ;;  %v6293_v1 = vld [vmem:[%s6454_s27 + $0x18] sm:$0xff]  }
 0x10a   : > { %v3966_v49 = vshll.u32 %v7728_v35, 16  ;;  %v3980_v50 = vshll.u32 %v7731_v58, 16  ;;  %v5479_v53 = vcombine.low %v7743_v45, %v7764_v27  ;;  %v5463_v22 = vrot.slane %v5447_v19, 9  ;;  %v6355_v60 = vld [vmem:[%s6454_s27 + $0xa0] sm:$0xf] }
 0x10b   : > { %v3973_v38 = vrot.slane %v3971_v47, 4  ;;  %v4437_v30 = vrot.slane %v8275_v59, 5  ;;  %v2296_v61 = vshrl.u32 %v5174_v55, 16  ;;  %v3976_v63 = vrot.slane %v3974_v29, 5  ;;  %v5403_v29 = vld [vmem:[%s6454_s27 + $0xcc] sm:$0xf] }
 0x10c   : > { %v3984_v18 = vshrl.u32 %v7731_v58, 16  ;;  %v2299_v43 = vshll.u32 %v5174_v55, 16  ;;  %v5464_v37 = vrot.slane %v5448_v33, 9  ;;  %v3935_v9 = vsel %vm6480_vm4, %v7725_v12, %v7664_v42  ;;  %v7807_v55 = vld [vmem:[%s6454_s27 + $0xd0] sm:$0xf] }
 0x10d   : > { %5914 = vmatmul.mubr.msk.bf16.gmra.mrb[12].mxu0 %vm709_vm3, %v7662_v44  ;;  %v4434_v44 = vrot.slane %v8274_v23, 5  ;;  %v2298_v51 = vrot.slane %v2296_v61, 4  ;;  %v3953_v11 = vor.u32 %v7749_v62, %v7739_v21  ;;  %v4441_v47 = vrot.slane %v8278_v28, 5  ;;  %v6294_v21 = vld [vmem:[%s6454_s27 + $0x24] sm:$0xff]   ;;  %v6359_v27 = vld [vmem:[%s6454_s27 + $0xac] sm:$0xf] }
 0x10e   : > { %5760 = vmatmul.mubr.msk.bf16.gmra.mrb[28].mxu1 %vm709_vm3, %v5065_v56  ;;  %5917 = vmatprep.mubr.msk.bf16.mxu0 %vm709_vm3, %v7666_v41  ;;  %v8277_v56 = vld [vmem:[#allocation5_spill] sm:$0xff]  ;;  %v2301_v46 = vrot.slane %v2299_v43, 5  ;;  %v3945_v19 = vsel %vm6480_vm4, %v7747_v8, %v7676_v17  ;;  %v4444_v12 = vrot.slane %v7559_v2, 5  ;;  %v7815_v62 = vrot.slane %v3980_v50, 5  ;;  %v5449_v8 = vld [vmem:[%s6454_s27 + $0x90] sm:$0xe] }
 0x10f   : > { %5765 = vmatprep.mubr.msk.bf16.mxu1 %vm709_vm3, %v6292_v6  ;;  %v2318_v41 = vsel %vm6480_vm4, %v8277_v56, %v8276_v16  ;;  %v7789_v20 = vsel %vm6706_vm7, %v5463_v22, %v4434_v44  ;;  %v4436_v31 = vrot.slane %v4434_v44, 4  ;;  %v3963_v6 = vor.u32 %v7758_v52, %v7756_v4  ;;  %v7821_v52 = vld [vmem:[%s6454_s27 + $0xc8] sm:$0x1]  ;;  %v8280_v16 = vld [vmem:[#allocation2_spill] sm:$0xff] }
 0x110   : > { %v3986_v22 = vrot.slane %v3984_v18, 4  ;;  %v2302_v17 = vor.u32 %v2301_v46, %v2298_v51  ;;  %v3968_v23 = vrot.slane %v3966_v49, 5  ;;  %v3977_v44 = vor.u32 %v3976_v63, %v3973_v38  ;;  %v8281_v51 = vld [vmem:[#allocation3_spill] sm:$0xff] }
 0x111   : > { %v7811_v42 = vsel %vm6706_vm7, %v4436_v31, %v4437_v30  ;;  %v7825_v59 = vsel %vm6706_vm7, %v5464_v37, %v4441_v47  ;;  %v4443_v30 = vrot.slane %v4441_v47, 4  ;;  %v3995_v2 = vshrl.u32 %v5403_v29, 16 }
 0x112   : > { %v5480_v33 = vcombine.low %v7789_v20, %v7811_v42  ;;  %v3998_v50 = vshll.u32 %v5403_v29, 16  ;;  %v4004_v61 = vshll.u32 %v7807_v55, 16  ;;  %v2303_v18 = vrot.slane %v2302_v17, 4  ;;  %v6295_v29 = vld [vmem:[%s6454_s27 + $0x30] sm:$0xff]  }
 0x113   : > { %v4008_v49 = vshrl.u32 %v7807_v55, 16  ;;  %v7836_v38 = vsel %vm6706_vm7, %v4443_v30, %v4444_v12  ;;  %v5465_v63 = vrot.slane %v5449_v8, 9  ;;  %v3987_v56 = vor.u32 %v3986_v22, %v7815_v62 }
 0x114   : > { %v3990_v31 = vshll.u32 %v7821_v52, 16  ;;  %v5481_v37 = vcombine.low %v7825_v59, %v7836_v38  ;;  %v5419_v46 = vcombine.low %v3935_v9, %v3945_v19  ;;  %v3954_v28 = vrot.slane %v3953_v11, 4  ;;  %v5450_v11 = vld [vmem:[%s6454_s27 + $0x9c] sm:$0xe] }
 0x115   : > { %5918 = vmatmul.mubr.msk.bf16.gmra.mrb[16].mxu0 %vm709_vm3, %v7668_v5  ;;  %v8279_v5 = vld [vmem:[#allocation15_spill] sm:$0xff]  ;;  %v3964_v47 = vrot.slane %v3963_v6, 4  ;;  %v3978_v12 = vrot.slane %v3977_v44, 4  ;;  %v4451_v8 = vrot.slane %v7568_v3, 5  ;;  %v3997_v30 = vrot.slane %v3995_v2, 4  ;;  %v6296_v19 = vld [vmem:[%s6454_s27 + $0x3c] sm:$0xff]  }
 0x116   : > { %5766 = vmatmul.mubr.msk.bf16.vlgmr.msra.gmra.mrb[0].mxu1 %vm709_vm3, %v6293_v1  ;;  %5921 = vmatprep.mubr.msk.bf16.mxu0 %vm709_vm3, %v7670_v7  ;;  %v4448_v43 = vrot.slane %v8279_v5, 5  ;;  %v2308_v7 = vsel %vm6480_vm4, %v2303_v18, %v8281_v51  ;;  %v4000_v18 = vrot.slane %v3998_v50, 5  ;;  %v7859_v5 = vrot.slane %v4004_v61, 5 }
 0x117   : > { %5968 = vmatpush3.bf16.msra.mxu1 %v8280_v16  ;;  %5769 = vmatprep.mubr.msk.bf16.mxu1 %vm709_vm3, %v6294_v21  ;;  %v7848_v1 = vcombine.low %v2308_v7, %v2318_v41  ;;  %v7852_v21 = vld [vmem:[%s6454_s27 + $0xd4] sm:$0x1]  ;;  %v4010_v9 = vrot.slane %v4008_v49, 4  ;;  %v3988_v41 = vrot.slane %v3987_v56, 4  ;;  %v3992_v6 = vrot.slane %v3990_v31, 5 }
 0x118   : > { %v7856_v22 = vsel %vm6706_vm7, %v5465_v63, %v4448_v43  ;;  %v4450_v17 = vrot.slane %v4448_v43, 4  ;;  %v3959_v63 = vsel %vm6480_vm4, %v3954_v28, %v7756_v4  ;;  %v3969_v2 = vsel %vm6480_vm4, %v3964_v47, %v3968_v23  ;;  %v6346_v16 = vld [vmem:[%s6454_s27 + $0x1c] sm:$0xf]  ;;  %v5451_v28 = vld [vmem:[%s6454_s27 + $0xa8] sm:$0xe] }
 0x119   : > { %v4014_v50 = vshll.u32 %v7852_v21, 16  ;;  %v5466_v61 = vrot.slane %v5450_v11, 9  ;;  %v4455_v49 = vrot.slane %v7556_v25, 5  ;;  %v3983_v4 = vsel %vm6480_vm4, %v3978_v12, %v7815_v62  ;;  %v5439_v62 = vld [vmem:[%s6454_s27 + $0x18] sm:$0xe]  ;;  %v6297_v47 = vld [vmem:[%s6454_s27 + $0x48] sm:$0xff]  }
 0x11a   : > { %v7865_v44 = vsel %vm6706_vm7, %v4450_v17, %v4451_v8  ;;  %v4011_v43 = vor.u32 %v4010_v9, %v7859_v5  ;;  %v4458_v23 = vrot.slane %v7601_v57, 5  ;;  %v3993_v25 = vsel %vm6480_vm4, %v3988_v41, %v3992_v6  ;;  %v6347_v11 = vld [vmem:[%s6454_s27 + $0x20] sm:$0x1] }
 0x11b   : > { %v5482_v3 = vcombine.low %v7856_v22, %v7865_v44  ;;  %v4378_v56 = vrot.slane %v6346_v16, 5  ;;  %v7891_v31 = vsel %vm6706_vm7, %v5466_v61, %v4455_v49  ;;  %v4457_v51 = vrot.slane %v4455_v49, 4  ;;  %v5452_v49 = vld [vmem:[%s6454_s27 + $0xb4] sm:$0xe] }
 0x11c   : > { %v5420_v7 = vcombine.low %v3959_v63, %v3969_v2  ;;  %v4012_v17 = vrot.slane %v4011_v43, 4  ;;  %v5467_v41 = vrot.slane %v5451_v28, 9  ;;  %v4462_v6 = vrot.slane %v7604_v34, 5  ;;  %v5440_v2 = vld [vmem:[%s6454_s27 + $0x24] sm:$0xe] }
 0x11d   : > { %5922 = vmatmul.mubr.msk.bf16.gmra.mrb[20].mxu0 %vm709_vm3, %v7703_v24  ;;  %v4001_v24 = vor.u32 %v4000_v18, %v3997_v30  ;;  %v7896_v57 = vsel %vm6706_vm7, %v4457_v51, %v4458_v23  ;;  %v6298_v30 = vld [vmem:[%s6454_s27 + $0x54] sm:$0xff]   ;;  %v5455_v18 = vrot.slane %v5439_v62, 9  ;;  %v4380_v9 = vrot.slane %v4378_v56, 4  ;;  %v6350_v28 = vld [vmem:[%s6454_s27 + $0x2c] sm:$0x1] }
 0x11e   : > { %5770 = vmatmul.mubr.msk.bf16.gmra.mrb[4].mxu1 %vm709_vm3, %v6295_v29  ;;  %5925 = vmatprep.mubr.msk.bf16.mxu0 %vm709_vm3, %v5419_v46  ;;  %v4016_v46 = vrot.slane %v4014_v50, 5  ;;  %v5421_v29 = vcombine.low %v3983_v4, %v3993_v25  ;;  %v5483_v8 = vcombine.low %v7891_v31, %v7896_v57  ;;  %v4465_v63 = vrot.slane %v7614_v48, 5  ;;  %v6348_v50 = vld [vmem:[%s6454_s27 + $0x28] sm:$0xf]  ;;  %v5441_v25 = vld [vmem:[%s6454_s27 + $0x30] sm:$0xe] }
 0x11f   : > { %5773 = vmatprep.mubr.msk.bf16.mxu1 %vm709_vm3, %v6296_v19  ;;  %v4002_v12 = vrot.slane %v4001_v24, 4  ;;  %v4381_v19 = vrot.slane %v6347_v11, 5  ;;  %v4385_v61 = vrot.slane %v6348_v50, 5  ;;  %v7919_v48 = vsel %vm6706_vm7, %v5467_v41, %v4462_v6  ;;  %v6300_v11 = vld [vmem:[%s6454_s27 + $0x6c] sm:$0xff]   ;;  %v8282_v41 = vld [vmem:[#allocation6_spill] sm:$0xff] }
 0x120   : > { %v4017_v34 = vsel %vm6480_vm4, %v4012_v17, %v4016_v46  ;;  %v4464_v24 = vrot.slane %v4462_v6, 4  ;;  %v4379_v43 = vsel %vm6706_vm7, %v5455_v18, %v4378_v56  ;;  %v5456_v51 = vrot.slane %v5440_v2, 9  ;;  %v5453_v50 = vld [vmem:[%s6454_s27 + $0xc0] sm:$0xe]  ;;  %v6364_v31 = vld [vmem:[%s6454_s27 + $0xc8] sm:$0x1] }
 0x121   : > { %v4007_v4 = vsel %vm6480_vm4, %v4002_v12, %v7859_v5  ;;  %v4382_v23 = vsel %vm6706_vm7, %v4380_v9, %v4381_v19  ;;  %v6349_v5 = vld [vmem:[%s6454_s27 + $0x34] sm:$0xf]  ;;  %v6299_v12 = vld [vmem:[%s6454_s27 + $0x60] sm:$0xff]   ;;  %v5457_v18 = vrot.slane %v5441_v25, 9  ;;  %v4472_v9 = vrot.slane %v7728_v35, 5 }
 0x122   : > { %v4392_v16 = vrot.slane %v6349_v5, 5  ;;  %v7930_v62 = vsel %vm6706_vm7, %v4464_v24, %v4465_v63  ;;  %v5422_v46 = vcombine.low %v4007_v4, %v4017_v34  ;;  %v5472_v17 = vcombine.low %v4379_v43, %v4382_v23  ;;  %v5442_v24 = vld [vmem:[%s6454_s27 + $0x3c] sm:$0xe] }
 0x123   : > { %v5484_v56 = vcombine.low %v7919_v48, %v7930_v62  ;;  %v4395_v6 = vrot.slane %v8282_v41, 5  ;;  %v4386_v35 = vsel %vm6706_vm7, %v5456_v51, %v4385_v61  ;;  %v5469_v5 = vrot.slane %v5453_v50, 9 }
 0x124   : > { %v4394_v19 = vrot.slane %v4392_v16, 4  ;;  %v4393_v23 = vsel %vm6706_vm7, %v5457_v18, %v4392_v16  ;;  %v4479_v51 = vrot.slane %v7821_v52, 5  ;;  %v2459_v57 = vshll.u32 %v6364_v31, 16 }
 0x125   : > { %5926 = vmatmul.mubr.msk.bf16.gmra.mrb[24].mxu0 %vm709_vm3, %v5420_v7  ;;  %v5468_v7 = vrot.slane %v5452_v49, 9 }
 0x126   : > { %5774 = vmatmul.mubr.msk.bf16.gmra.mrb[8].mxu1 %vm709_vm3, %v6297_v47  ;;  %5929 = vmatprep.mubr.msk.bf16.mxu0 %vm709_vm3, %v5421_v29  ;;  %v4388_v47 = vrot.slane %v6350_v28, 5  ;;  %v4469_v29 = vrot.slane %v7679_v39, 5  ;;  %v8283_v39 = vld [vmem:[#allocation7_spill] sm:$0xff]  ;;  %v4396_v25 = vsel %vm6706_vm7, %v4394_v19, %v4395_v6  ;;  %v5458_v28 = vrot.slane %v5442_v24, 9 }
 0x127   : > { %5777 = vmatprep.mubr.msk.bf16.mxu1 %vm709_vm3, %v6298_v30  ;;  %v4387_v30 = vrot.slane %v4385_v61, 4  ;;  %v4399_v49 = vrot.slane %v8283_v39, 5  ;;  %v4476_v61 = vrot.slane %v7731_v58, 5  ;;  %v6351_v39 = vld [vmem:[%s6454_s27 + $0x70] sm:$0xf]  ;;  %v4483_v24 = vrot.slane %v7807_v55, 5 }
 0x128   : > { %v7942_v63 = vsel %vm6706_vm7, %v5468_v7, %v4469_v29  ;;  %v4471_v2 = vrot.slane %v4469_v29, 4  ;;  %v5171_v7 = vld [vmem:[%s6454_s27 + $0x6c] sm:$0xf]  ;;  %v8284_v29 = vld [vmem:[#allocation8_spill] sm:$0xff] }
 0x129   : > { %v4389_v34 = vsel %vm6706_vm7, %v4387_v30, %v4388_v47  ;;  %v4401_v47 = vrot.slane %v4399_v49, 4  ;;  %v6301_v30 = vld [vmem:[%s6454_s27 + $0x78] sm:$0xff]   ;;  %v7973_v16 = vsel %vm6706_vm7, %v5469_v5, %v4476_v61  ;;  %v4478_v18 = vrot.slane %v4476_v61, 4 }
 0x12a   : > { %v7949_v4 = vsel %vm6706_vm7, %v4471_v2, %v4472_v9  ;;  %v5474_v9 = vcombine.low %v4393_v23, %v4396_v25  ;;  %v2272_v19 = vshrl.u32 %v5171_v7, 16  ;;  %v2275_v41 = vshll.u32 %v5171_v7, 16 }
 0x12b   : > { %v5485_v43 = vcombine.low %v7942_v63, %v7949_v4  ;;  %v7978_v58 = vsel %vm6706_vm7, %v4478_v18, %v4479_v51  ;;  %v4400_v6 = vsel %vm6706_vm7, %v5458_v28, %v4399_v49  ;;  %v4486_v49 = vrot.slane %v7852_v21, 5  ;;  %v6303_v51 = vld [vmem:[%s6454_s27 + $0x90] sm:$0xff]   ;;  %v6304_v21 = vld [vmem:[%s6454_s27 + $0x9c] sm:$0xff]  }
 0x12c   : > { %v5486_v50 = vcombine.low %v7973_v16, %v7978_v58  ;;  %v2274_v23 = vrot.slane %v2272_v19, 4  ;;  %v2277_v25 = vrot.slane %v2275_v41, 5  ;;  %v4485_v7 = vrot.slane %v4483_v24, 4 }
 0x12d   : > { %5930 = vmatmul.mubr.msk.bf16.gmra.mrb[28].mxu0 %vm709_vm3, %v5422_v46  ;;  %v5473_v46 = vcombine.low %v4386_v35, %v4389_v34  ;;  %v2281_v35 = vshll.u32 %v6351_v39, 16  ;;  %v2285_v34 = vshrl.u32 %v6351_v39, 16 }
 0x12e   : > { %5778 = vmatmul.mubr.msk.bf16.gmra.mrb[12].mxu1 %vm709_vm3, %v6299_v12  ;;  %5935 = vmatprep.mubr.msk.bf16.mxu0 %vm709_vm3, %v5472_v17  ;;  %v4402_v12 = vrot.slane %v8284_v29, 5  ;;  %v5454_v17 = vld [vmem:[%s6454_s27 + $0xcc] sm:$0xe]  ;;  %v8000_v55 = vsel %vm6706_vm7, %v4485_v7, %v4486_v49 }
 0x12f   : > { %5781 = vmatprep.mubr.msk.bf16.mxu1 %vm709_vm3, %v6300_v11  ;;  %v6302_v11 = vld [vmem:[%s6454_s27 + $0x84] sm:$0xff]   ;;  %v5470_v52 = vrot.slane %v5454_v17, 9  ;;  %v2287_v28 = vrot.slane %v2285_v34, 4  ;;  %v6352_v17 = vld [vmem:[%s6454_s27 + $0x74] sm:$0x1] }
 0x130   : > { %v4403_v2 = vsel %vm6706_vm7, %v4401_v47, %v4402_v12  ;;  %v5177_v47 = vld [vmem:[%s6454_s27 + $0x84] sm:$0xf]  ;;  %v2278_v12 = vor.u32 %v2277_v25, %v2274_v23  ;;  %v6306_v34 = vld [vmem:[%s6454_s27 + $0xb4] sm:$0xff]  }
 0x131   : > { %v7995_v5 = vsel %vm6706_vm7, %v5470_v52, %v4483_v24  ;;  %v5475_v61 = vcombine.low %v4400_v6, %v4403_v2  ;;  %v2323_v18 = vshll.u32 %v5177_v47, 16  ;;  %v5180_v6 = vld [vmem:[%s6454_s27 + $0x90] sm:$0xf]  ;;  %v6305_v2 = vld [vmem:[%s6454_s27 + $0xa8] sm:$0xff]  }
 0x132   : > { %v5487_v29 = vcombine.low %v7995_v5, %v8000_v55  ;;  %v2279_v52 = vrot.slane %v2278_v12, 4  ;;  %v2344_v23 = vshrl.u32 %v5180_v6, 16  ;;  %v2347_v25 = vshll.u32 %v5180_v6, 16 }
 0x133   : > { %v2377_v12 = vshll.u32 %v6355_v60, 16 }
 0x134   : > { %v2349_v14 = vrot.slane %v2347_v25, 5  ;;  %v6358_v25 = vld [vmem:[%s6454_s27 + $0xa4] sm:$0x1] }
 0x135   : > { %5936 = vmatmul.mubr.msk.bf16.vlgmr.msra.gmra.mrb[0].mxu0 %vm709_vm3, %v5473_v46  ;;  %v2283_v46 = vrot.slane %v2281_v35, 5  ;;  %v5183_v35 = vld [vmem:[%s6454_s27 + $0x9c] sm:$0xf]  ;;  %v8042_v6 = vrot.slane %v2377_v12, 5 }
 0x136   : > { %5782 = vmatmul.mubr.msk.bf16.gmra.mrb[16].mxu1 %vm709_vm3, %v6301_v30  ;;  %5939 = vmatprep.mubr.msk.bf16.mxu0 %vm709_vm3, %v5474_v9  ;;  %v2291_v30 = vshll.u32 %v6352_v17, 16  ;;  %v2320_v9 = vshrl.u32 %v5177_v47, 16  ;;  %v2371_v47 = vshll.u32 %v5183_v35, 16  ;;  %v6356_v17 = vld [vmem:[%s6454_s27 + $0x8c] sm:$0x1] }
 0x137   : > { %5785 = vmatprep.mubr.msk.bf16.mxu1 %vm709_vm3, %v6302_v11  ;;  %v2288_v13 = vor.u32 %v2287_v28, %v2283_v46  ;;  %v6353_v11 = vld [vmem:[%s6454_s27 + $0x88] sm:$0xf]  ;;  %v2284_v7 = vsel %vm6480_vm4, %v2279_v52, %v2283_v46 }
 0x138   : > { %v2329_v19 = vshll.u32 %v6353_v11, 16  ;;  %v2333_v41 = vshrl.u32 %v6353_v11, 16  ;;  %v2293_v0 = vrot.slane %v2291_v30, 5  ;;  %v2322_v36 = vrot.slane %v2320_v9, 4 }
 0x139   : > { %v2289_v39 = vrot.slane %v2288_v13, 4  ;;  %v2339_v30 = vshll.u32 %v6356_v17, 16  ;;  %v2346_v9 = vrot.slane %v2344_v23, 4  ;;  %v2373_v11 = vrot.slane %v2371_v47, 5 }
 0x13a   : > { %v8019_v24 = vrot.slane %v2329_v19, 5  ;;  %v2335_v49 = vrot.slane %v2333_v41, 4  ;;  %v6307_v19 = vld [vmem:[%s6454_s27 + $0xc0] sm:$0xff]  }
 0x13b   : > { %v2294_v46 = vsel %vm6480_vm4, %v2289_v39, %v2293_v0  ;;  %v5186_v39 = vld [vmem:[%s6454_s27 + $0xa8] sm:$0xf] }
 0x13c   : > { %v2336_v13 = vor.u32 %v2335_v49, %v8019_v24  ;;  %v5204_v41 = vcombine.low %v2284_v7, %v2294_v46  ;;  %v2387_v7 = vshll.u32 %v6358_v25, 16  ;;  %v2395_v45 = vshll.u32 %v5186_v39, 16 }
 0x13d   : > { %5940 = vmatmul.mubr.msk.bf16.gmra.mrb[4].mxu0 %vm709_vm3, %v5475_v61  ;;  %v6354_v61 = vld [vmem:[%s6454_s27 + $0x94] sm:$0xf] }
 0x13e   : > { %5786 = vmatmul.mubr.msk.bf16.gmra.mrb[20].mxu1 %vm709_vm3, %v6303_v51  ;;  %5943 = vmatprep.mubr.msk.bf16.mxu0 %vm709_vm3, %v5476_v10  ;;  %v2325_v10 = vrot.slane %v2323_v18, 5  ;;  %v2353_v51 = vshll.u32 %v6354_v61, 16  ;;  %v2357_v28 = vshrl.u32 %v6354_v61, 16  ;;  %v2337_v0 = vrot.slane %v2336_v13, 4 }
 0x13f   : > { %5789 = vmatprep.mubr.msk.bf16.mxu1 %vm709_vm3, %v6304_v21  ;;  %v2368_v21 = vshrl.u32 %v5183_v35, 16  ;;  %v6357_v35 = vld [vmem:[%s6454_s27 + $0x98] sm:$0x1]  ;;  %v2392_v61 = vshrl.u32 %v5186_v39, 16  ;;  %v5192_v39 = vld [vmem:[%s6454_s27 + $0xc0] sm:$0xf] }
 0x140   : > { %v2326_v15 = vor.u32 %v2325_v10, %v2322_v36  ;;  %v8039_v26 = vrot.slane %v2353_v51, 5  ;;  %v2341_v36 = vrot.slane %v2339_v30, 5  ;;  %v2350_v10 = vor.u32 %v2349_v14, %v2346_v9  ;;  %v5189_v51 = vld [vmem:[%s6454_s27 + $0xb4] sm:$0xf] }
 0x141   : > { %v2370_v18 = vrot.slane %v2368_v21, 4  ;;  %v2405_v21 = vshrl.u32 %v6359_v27, 16  ;;  %v2416_v20 = vshrl.u32 %v5189_v51, 16  ;;  %v2419_v42 = vshll.u32 %v5189_v51, 16 }
 0x142   : > { %v2327_v52 = vrot.slane %v2326_v15, 4  ;;  %v2342_v46 = vsel %vm6480_vm4, %v2337_v0, %v2341_v36  ;;  %v2351_v15 = vrot.slane %v2350_v10, 4  ;;  %v2389_v30 = vrot.slane %v2387_v7, 5 }
 0x143   : > { %v2374_v23 = vor.u32 %v2373_v11, %v2370_v18  ;;  %v2394_v9 = vrot.slane %v2392_v61, 4  ;;  %v2407_v11 = vrot.slane %v2405_v21, 4  ;;  %v6363_v61 = vld [vmem:[%s6454_s27 + $0xbc] sm:$0x1] }
 0x144   : > { %v2332_v47 = vsel %vm6480_vm4, %v2327_v52, %v8019_v24  ;;  %v2356_v0 = vsel %vm6480_vm4, %v2351_v15, %v8039_v26  ;;  %v2435_v22 = vshll.u32 %v6363_v61, 16 }
 0x145   : > { %5944 = vmatmul.mubr.msk.bf16.gmra.mrb[8].mxu0 %vm709_vm3, %v5477_v40  ;;  %v2381_v40 = vshrl.u32 %v6355_v60, 16  ;;  %v2375_v17 = vrot.slane %v2374_v23, 4  ;;  %v5206_v24 = vcombine.low %v2332_v47, %v2342_v46 }
 0x146   : > { %5790 = vmatmul.mubr.msk.bf16.gmra.mrb[24].mxu1 %vm709_vm3, %v6305_v2  ;;  %5947 = vmatprep.mubr.msk.bf16.mxu0 %vm709_vm3, %v5478_v54  ;;  %v2359_v54 = vrot.slane %v2357_v28, 4 }
 0x147   : > { %5793 = vmatprep.mubr.msk.bf16.mxu1 %vm709_vm3, %v6306_v34  ;;  %v2383_v2 = vrot.slane %v2381_v40, 4  ;;  %v2363_v34 = vshll.u32 %v6357_v35, 16  ;;  %v2380_v10 = vsel %vm6480_vm4, %v2375_v17, %v8042_v6  ;;  %v2461_v17 = vrot.slane %v2459_v57, 5 }
 0x148   : > { %v2360_v49 = vor.u32 %v2359_v54, %v8039_v26  ;;  %v2397_v54 = vrot.slane %v2395_v45, 5  ;;  %v6361_v26 = vld [vmem:[%s6454_s27 + $0xb0] sm:$0x1] }
 0x149   : > { %v2384_v28 = vor.u32 %v2383_v2, %v8042_v6  ;;  %v2365_v60 = vrot.slane %v2363_v34, 5  ;;  %v2411_v35 = vshll.u32 %v6361_v26, 16  ;;  %v2440_v34 = vshrl.u32 %v5192_v39, 16 }
 0x14a   : > { %v2361_v13 = vrot.slane %v2360_v49, 4  ;;  %v2398_v38 = vor.u32 %v2397_v54, %v2394_v9  ;;  %v2443_v6 = vshll.u32 %v5192_v39, 16  ;;  %v6362_v49 = vld [vmem:[%s6454_s27 + $0xc4] sm:$0xf] }
 0x14b   : > { %v2385_v14 = vrot.slane %v2384_v28, 4  ;;  %v2449_v23 = vshll.u32 %v6362_v49, 16  ;;  %v2453_v25 = vshrl.u32 %v6362_v49, 16  ;;  %v2413_v45 = vrot.slane %v2411_v35, 5 }
 0x14c   : > { %v2366_v36 = vsel %vm6480_vm4, %v2361_v13, %v2365_v60  ;;  %v2399_v51 = vrot.slane %v2398_v38, 4  ;;  %v2437_v60 = vrot.slane %v2435_v22, 5 }
 0x14d   : > { %5948 = vmatmul.mubr.msk.bf16.gmra.mrb[12].mxu0 %vm709_vm3, %v5479_v53  ;;  %v2401_v53 = vshll.u32 %v6359_v27, 16  ;;  %v2390_v59 = vsel %vm6480_vm4, %v2385_v14, %v2389_v30  ;;  %v5207_v44 = vcombine.low %v2356_v0, %v2366_v36  ;;  %v2442_v27 = vrot.slane %v2440_v34, 4 }
 0x14e   : > { %5794 = vmatmul.mubr.msk.bf16.gmra.mrb[28].mxu1 %vm709_vm3, %v6307_v19  ;;  %5951 = vmatprep.mubr.msk.bf16.mxu0 %vm709_vm3, %v5480_v33  ;;  %v6360_v33 = vld [vmem:[%s6454_s27 + $0xb8] sm:$0xf]  ;;  %v2418_v19 = vrot.slane %v2416_v20, 4  ;;  %v2451_v21 = vrot.slane %v2449_v23, 5  ;;  %v2455_v47 = vrot.slane %v2453_v25, 4 }
 0x14f   : > { %5815 = vmatprep.mubr.msk.bf16.mxu1 %vm709_vm3, %v5204_v41  ;;  %v2425_v12 = vshll.u32 %v6360_v33, 16  ;;  %v2429_v40 = vshrl.u32 %v6360_v33, 16  ;;  %v2403_v18 = vrot.slane %v2401_v53, 5  ;;  %v2421_v41 = vrot.slane %v2419_v42, 5 }
 0x150   : > { %v2445_v53 = vrot.slane %v2443_v6, 5 }
 0x151   : > { %v2427_v52 = vrot.slane %v2425_v12, 5  ;;  %v2431_v2 = vrot.slane %v2429_v40, 4  ;;  %v2404_v20 = vsel %vm6480_vm4, %v2399_v51, %v2403_v18  ;;  %v2456_v12 = vor.u32 %v2455_v47, %v2451_v21 }
 0x152   : > { %v2446_v33 = vor.u32 %v2445_v53, %v2442_v27 }
 0x153   : > { %v2432_v7 = vor.u32 %v2431_v2, %v2427_v52  ;;  %v2457_v13 = vrot.slane %v2456_v12, 4  ;;  %v8134_v2 = vld [vmem:[%s8216_s2] ss:$0 sm:$0xff] }
 0x154   : > { %v2447_v40 = vrot.slane %v2446_v33, 4 }
 0x155   : > { %5952 = vmatmul.mubr.msk.bf16.gmra.mrb[16].mxu0 %vm709_vm3, %v5481_v37  ;;  %v2408_v37 = vor.u32 %v2407_v11, %v2403_v18  ;;  %v2433_v15 = vrot.slane %v2432_v7, 4  ;;  %v2462_v9 = vsel %vm6480_vm4, %v2457_v13, %v2461_v17 }
 0x156   : > { %5816 = vmatmul.mubr.msk.bf16.vlgmr.msra.gmra.mrb[16].mxu1 %vm709_vm3, %v7848_v1  ;;  %5955 = vmatprep.mubr.msk.bf16.mxu0 %vm709_vm3, %v5482_v3  ;;  %v2422_v1 = vor.u32 %v2421_v41, %v2418_v19  ;;  %v5208_v3 = vcombine.low %v2380_v10, %v2390_v59  ;;  %v2452_v30 = vsel %vm6480_vm4, %v2447_v40, %v2451_v21 }
 0x157   : > { %5819 = vmatprep.mubr.msk.bf16.mxu1 %vm709_vm3, %v5206_v24  ;;  %v2409_v28 = vrot.slane %v2408_v37, 4  ;;  %v2438_v48 = vsel %vm6480_vm4, %v2433_v15, %v2437_v60  ;;  %v5211_v14 = vcombine.low %v2452_v30, %v2462_v9 }
 0x158   : > { %v2423_v46 = vrot.slane %v2422_v1, 4 }
 0x159   : > { %v2414_v42 = vsel %vm6480_vm4, %v2409_v28, %v2413_v45 }
 0x15a   : > { %v5209_v62 = vcombine.low %v2404_v20, %v2414_v42 }
 0x15d   : > { %5956 = vmatmul.mubr.msk.bf16.gmra.mrb[20].mxu0 %vm709_vm3, %v5483_v8  ;;  %v2428_v8 = vsel %vm6480_vm4, %v2423_v46, %v2427_v52 }
 0x15e   : > { %5820 = vmatmul.mubr.msk.bf16.gmra.mrb[20].mxu1 %vm709_vm3, %v5207_v44  ;;  %5959 = vmatprep.mubr.msk.bf16.mxu0 %vm709_vm3, %v5484_v56  ;;  %v5210_v56 = vcombine.low %v2428_v8, %v2438_v48 }
 0x15f   : > { %5823 = vmatprep.mubr.msk.bf16.mxu1 %vm709_vm3, %v5208_v3 }
 0x165   : > { %5960 = vmatmul.mubr.msk.bf16.gmra.mrb[24].mxu0 %vm709_vm3, %v5485_v43 }
 0x166   : > { %5824 = vmatmul.mubr.msk.bf16.gmra.mrb[24].mxu1 %vm709_vm3, %v5209_v62  ;;  %5963 = vmatprep.mubr.msk.bf16.mxu0 %vm709_vm3, %v5486_v50 }
 0x167   : > { %5827 = vmatprep.mubr.msk.bf16.mxu1 %vm709_vm3, %v5210_v56 }
 0x16d   : > { %5964 = vmatmul.mubr.msk.bf16.gmra.mrb[28].mxu0 %vm709_vm3, %v5487_v29 }
 0x16e   : > { %5828 = vmatmul.mubr.msk.bf16.gmra.mrb[28].mxu1 %vm709_vm3, %v5211_v14 }
 0x1e9   : > { %v5767_v63 = vpop.f32.mrb[0].mxu1 }
 0x1ea   : > { %v1872_v4 = vpop.f32.mrb[1].mxu1 }
 0x1eb   : > { %v5768_v43 = vpop.f32.mrb[2].mxu1 }
 0x1ec   : > { %v1875_v16 = vpop.f32.mrb[3].mxu1 }
 0x1f1   : > { %v5771_v58 = vpop.f32.mrb[4].mxu1 }
 0x1f2   : > { %v1888_v50 = vpop.f32.mrb[5].mxu1 }
 0x1f3   : > { %v5772_v54 = vpop.f32.mrb[6].mxu1 }
 0x1f4   : > { %v1891_v18 = vpop.f32.mrb[7].mxu1 }
 0x1f9   : > { %v5775_v11 = vpop.f32.mrb[8].mxu1 }
 0x1fa   : > { %v1904_v32 = vpop.f32.mrb[9].mxu1 }
 0x1fb   : > { %v5776_v24 = vpop.f32.mrb[10].mxu1 }
 0x1fc   : > { %v1907_v19 = vpop.f32.mrb[11].mxu1 }
 0x201   : > { %v5779_v41 = vpop.f32.mrb[12].mxu1 }
 0x202   : > { %v1920_v52 = vpop.f32.mrb[13].mxu1 }
 0x203   : > { %v5780_v5 = vpop.f32.mrb[14].mxu1 }
 0x204   : > { %v1923_v55 = vpop.f32.mrb[15].mxu1 }
 0x208   : > { %v5937_v29 = vpop.f32.mrb[0].mxu0 }
 0x209   : > { %v5969_v39 = vadd.f32 %v5937_v29, %v5767_v63  ;;  %v4623_v0 = vpop.f32.mrb[1].mxu0 }
 0x20a   : > { %v5970_v36 = vadd.f32 %v4623_v0, %v1872_v4  ;;  %v5938_v10 = vpop.f32.mrb[2].mxu0 }
 0x20b   : > { %v4791_v59 = vadd.f32 %v5969_v39, %v8134_v2  ;;  %v5971_v38 = vadd.f32 %v5938_v10, %v5768_v43  ;;  %v4626_v37 = vpop.f32.mrb[3].mxu0 }
 0x20c   : > { %v4789_v26 = vadd.f32 %v5970_v36, %v8134_v2  ;;  %v5972_v35 = vadd.f32 %v4626_v37, %v1875_v16 }
 0x20d   : > { %4823 = vst [vmem:[%s8139_s24 + $0x10] sm:$0xff] %v4791_v59  ;;  %v4792_v34 = vadd.f32 %v5971_v38, %v8134_v2 }
 0x20e   : > { %4821 = vst [vmem:[%s8139_s24] sm:$0xff] %v4789_v26  ;;  %v4790_v6 = vadd.f32 %v5972_v35, %v8134_v2 }
 0x20f   : > { %4824 = vst [vmem:[%s8139_s24 + $0x18] sm:$0xff] %v4792_v34 }
 0x210   : > { %4822 = vst [vmem:[%s8139_s24 + $0x8] sm:$0xff] %v4790_v6  ;;  %v5941_v49 = vpop.f32.mrb[4].mxu0 }
 0x211   : > { %v5973_v23 = vadd.f32 %v5941_v49, %v5771_v58  ;;  %v4639_v25 = vpop.f32.mrb[5].mxu0 }
 0x212   : > { %v5974_v1 = vadd.f32 %v4639_v25, %v1888_v50  ;;  %v5942_v7 = vpop.f32.mrb[6].mxu0 }
 0x213   : > { %v4795_v61 = vadd.f32 %v5973_v23, %v8134_v2  ;;  %v5975_v22 = vadd.f32 %v5942_v7, %v5772_v54  ;;  %v4642_v44 = vpop.f32.mrb[7].mxu0 }
 0x214   : > { %v4793_v3 = vadd.f32 %v5974_v1, %v8134_v2  ;;  %v5976_v51 = vadd.f32 %v4642_v44, %v1891_v18 }
 0x215   : > { %4827 = vst [vmem:[%s8139_s24 + $0x30] sm:$0xff] %v4795_v61  ;;  %v4796_v28 = vadd.f32 %v5975_v22, %v8134_v2 }
 0x216   : > { %4825 = vst [vmem:[%s8139_s24 + $0x20] sm:$0xff] %v4793_v3  ;;  %v4794_v45 = vadd.f32 %v5976_v51, %v8134_v2 }
 0x217   : > { %4828 = vst [vmem:[%s8139_s24 + $0x38] sm:$0xff] %v4796_v28 }
 0x218   : > { %4826 = vst [vmem:[%s8139_s24 + $0x28] sm:$0xff] %v4794_v45  ;;  %v5945_v27 = vpop.f32.mrb[8].mxu0 }
 0x219   : > { %v5977_v53 = vadd.f32 %v5945_v27, %v5775_v11  ;;  %v4655_v21 = vpop.f32.mrb[9].mxu0 }
 0x21a   : > { %v5978_v47 = vadd.f32 %v4655_v21, %v1904_v32  ;;  %v5946_v46 = vpop.f32.mrb[10].mxu0 }
 0x21b   : > { %v4799_v15 = vadd.f32 %v5977_v53, %v8134_v2  ;;  %v5979_v60 = vadd.f32 %v5946_v46, %v5776_v24  ;;  %v4658_v20 = vpop.f32.mrb[11].mxu0 }
 0x21c   : > { %v4797_v42 = vadd.f32 %v5978_v47, %v8134_v2  ;;  %v5980_v33 = vadd.f32 %v4658_v20, %v1907_v19 }
 0x21d   : > { %4831 = vst [vmem:[%s8139_s24 + $0x50] sm:$0xff] %v4799_v15  ;;  %v4800_v12 = vadd.f32 %v5979_v60, %v8134_v2 }
 0x21e   : > { %4829 = vst [vmem:[%s8139_s24 + $0x40] sm:$0xff] %v4797_v42  ;;  %v4798_v31 = vadd.f32 %v5980_v33, %v8134_v2 }
 0x21f   : > { %4832 = vst [vmem:[%s8139_s24 + $0x58] sm:$0xff] %v4800_v12 }
 0x220   : > { %4830 = vst [vmem:[%s8139_s24 + $0x48] sm:$0xff] %v4798_v31  ;;  %v5949_v57 = vpop.f32.mrb[12].mxu0 }
 0x221   : > { %v5981_v8 = vadd.f32 %v5949_v57, %v5779_v41  ;;  %v4671_v48 = vpop.f32.mrb[13].mxu0 }
 0x222   : > { %v5982_v62 = vadd.f32 %v4671_v48, %v1920_v52  ;;  %v5950_v56 = vpop.f32.mrb[14].mxu0 }
 0x223   : > { %v4803_v40 = vadd.f32 %v5981_v8, %v8134_v2  ;;  %v5983_v13 = vadd.f32 %v5950_v56, %v5780_v5  ;;  %v4674_v17 = vpop.f32.mrb[15].mxu0 }
 0x224   : > { %v4801_v30 = vadd.f32 %v5982_v62, %v8134_v2  ;;  %v5984_v9 = vadd.f32 %v4674_v17, %v1923_v55 }
 0x225   : > { %4835 = vst [vmem:[%s8139_s24 + $0x70] sm:$0xff] %v4803_v40  ;;  %v4804_v14 = vadd.f32 %v5983_v13, %v8134_v2 }
 0x226   : > { %4833 = vst [vmem:[%s8139_s24 + $0x60] sm:$0xff] %v4801_v30  ;;  %v4802_v63 = vadd.f32 %v5984_v9, %v8134_v2 }
 0x227   : > { %4836 = vst [vmem:[%s8139_s24 + $0x78] sm:$0xff] %v4804_v14 }
 0x228   : > { %4834 = vst [vmem:[%s8139_s24 + $0x68] sm:$0xff] %v4802_v63  ;;  %v5953_v4 = vpop.f32.mrb[16].mxu0 }
 0x229   : > { %v5817_v43 = vpop.f32.mrb[16].mxu1  ;;  %v4687_v16 = vpop.f32.mrb[17].mxu0 }
 0x22a   : > { %v5985_v58 = vadd.f32 %v5953_v4, %v5817_v43  ;;  %v2662_v50 = vpop.f32.mrb[17].mxu1  ;;  %v5954_v54 = vpop.f32.mrb[18].mxu0 }
 0x22b   : > { %v5986_v18 = vadd.f32 %v4687_v16, %v2662_v50  ;;  %v5818_v11 = vpop.f32.mrb[18].mxu1  ;;  %v4690_v32 = vpop.f32.mrb[19].mxu0 }
 0x22c   : > { %v4807_v24 = vadd.f32 %v5985_v58, %v8134_v2  ;;  %v5987_v19 = vadd.f32 %v5954_v54, %v5818_v11  ;;  %v2665_v41 = vpop.f32.mrb[19].mxu1 }
 0x22d   : > { %v4805_v52 = vadd.f32 %v5986_v18, %v8134_v2  ;;  %v5988_v5 = vadd.f32 %v4690_v32, %v2665_v41 }
 0x22e   : > { %4839 = vst [vmem:[%s8139_s24 + $0x90] sm:$0xff] %v4807_v24  ;;  %v4808_v55 = vadd.f32 %v5987_v19, %v8134_v2 }
 0x22f   : > { %4837 = vst [vmem:[%s8139_s24 + $0x80] sm:$0xff] %v4805_v52  ;;  %v4806_v29 = vadd.f32 %v5988_v5, %v8134_v2 }
 0x230   : > { %4840 = vst [vmem:[%s8139_s24 + $0x98] sm:$0xff] %v4808_v55  ;;  %v5957_v39 = vpop.f32.mrb[20].mxu0 }
 0x231   : > { %4838 = vst [vmem:[%s8139_s24 + $0x88] sm:$0xff] %v4806_v29  ;;  %v5821_v0 = vpop.f32.mrb[20].mxu1  ;;  %v4703_v36 = vpop.f32.mrb[21].mxu0 }
 0x232   : > { %v5989_v10 = vadd.f32 %v5957_v39, %v5821_v0  ;;  %v2678_v59 = vpop.f32.mrb[21].mxu1  ;;  %v5958_v38 = vpop.f32.mrb[22].mxu0 }
 0x233   : > { %v5990_v37 = vadd.f32 %v4703_v36, %v2678_v59  ;;  %v5822_v26 = vpop.f32.mrb[22].mxu1  ;;  %v4706_v35 = vpop.f32.mrb[23].mxu0 }
 0x234   : > { %v4811_v34 = vadd.f32 %v5989_v10, %v8134_v2  ;;  %v5991_v6 = vadd.f32 %v5958_v38, %v5822_v26  ;;  %v2681_v49 = vpop.f32.mrb[23].mxu1 }
 0x235   : > { %v4809_v23 = vadd.f32 %v5990_v37, %v8134_v2  ;;  %v5992_v25 = vadd.f32 %v4706_v35, %v2681_v49 }
 0x236   : > { %4843 = vst [vmem:[%s8139_s24 + $0xb0] sm:$0xff] %v4811_v34  ;;  %v4812_v1 = vadd.f32 %v5991_v6, %v8134_v2 }
 0x237   : > { %4841 = vst [vmem:[%s8139_s24 + $0xa0] sm:$0xff] %v4809_v23  ;;  %v4810_v7 = vadd.f32 %v5992_v25, %v8134_v2 }
 0x238   : > { %4844 = vst [vmem:[%s8139_s24 + $0xb8] sm:$0xff] %v4812_v1  ;;  %v5961_v61 = vpop.f32.mrb[24].mxu0 }
 0x239   : > { %4842 = vst [vmem:[%s8139_s24 + $0xa8] sm:$0xff] %v4810_v7  ;;  %v5825_v22 = vpop.f32.mrb[24].mxu1  ;;  %v4719_v44 = vpop.f32.mrb[25].mxu0 }
 0x23a   : > { %v5993_v3 = vadd.f32 %v5961_v61, %v5825_v22  ;;  %v2694_v51 = vpop.f32.mrb[25].mxu1  ;;  %v5962_v28 = vpop.f32.mrb[26].mxu0 }
 0x23b   : > { %v5994_v45 = vadd.f32 %v4719_v44, %v2694_v51  ;;  %v5826_v27 = vpop.f32.mrb[26].mxu1  ;;  %v4722_v53 = vpop.f32.mrb[27].mxu0 }
 0x23c   : > { %v4815_v21 = vadd.f32 %v5993_v3, %v8134_v2  ;;  %v5995_v47 = vadd.f32 %v5962_v28, %v5826_v27  ;;  %v2697_v46 = vpop.f32.mrb[27].mxu1 }
 0x23d   : > { %v4813_v15 = vadd.f32 %v5994_v45, %v8134_v2  ;;  %v5996_v60 = vadd.f32 %v4722_v53, %v2697_v46 }
 0x23e   : > { %4847 = vst [vmem:[%s8139_s24 + $0xd0] sm:$0xff] %v4815_v21  ;;  %v4816_v20 = vadd.f32 %v5995_v47, %v8134_v2 }
 0x23f   : > { %4845 = vst [vmem:[%s8139_s24 + $0xc0] sm:$0xff] %v4813_v15  ;;  %v4814_v42 = vadd.f32 %v5996_v60, %v8134_v2 }
 0x240   : > { %4848 = vst [vmem:[%s8139_s24 + $0xd8] sm:$0xff] %v4816_v20  ;;  %v5965_v33 = vpop.f32.mrb[28].mxu0 }
 0x241   : > { %4846 = vst [vmem:[%s8139_s24 + $0xc8] sm:$0xff] %v4814_v42  ;;  %v5829_v12 = vpop.f32.mrb[28].mxu1  ;;  %v4735_v31 = vpop.f32.mrb[29].mxu0 }
 0x242   : > { %v5997_v57 = vadd.f32 %v5965_v33, %v5829_v12  ;;  %v2710_v8 = vpop.f32.mrb[29].mxu1  ;;  %v5966_v48 = vpop.f32.mrb[30].mxu0 }
 0x243   : > { %v5998_v62 = vadd.f32 %v4735_v31, %v2710_v8  ;;  %v5830_v56 = vpop.f32.mrb[30].mxu1  ;;  %v4738_v40 = vpop.f32.mrb[31].mxu0 }
 0x244   : > { %v4819_v13 = vadd.f32 %v5997_v57, %v8134_v2  ;;  %v5999_v17 = vadd.f32 %v5966_v48, %v5830_v56  ;;  %v2713_v30 = vpop.f32.mrb[31].mxu1 }
 0x245   : > { %v4817_v9 = vadd.f32 %v5998_v62, %v8134_v2  ;;  %v6000_v14 = vadd.f32 %v4738_v40, %v2713_v30 }
 0x246   : > { %4851 = vst [vmem:[%s8139_s24 + $0xf0] sm:$0xff] %v4819_v13  ;;  %v4820_v63 = vadd.f32 %v5999_v17, %v8134_v2 }
 0x247   : > { %4849 = vst [vmem:[%s8139_s24 + $0xe0] sm:$0xff] %v4817_v9  ;;  %v4818_v4 = vadd.f32 %v6000_v14, %v8134_v2 }
 0x248   : > { %4852 = vst [vmem:[%s8139_s24 + $0xf8] sm:$0xff] %v4820_v63 }
 0x249   : > { %4850 = vst [vmem:[%s8139_s24 + $0xe8] sm:$0xff] %v4818_v4 }
 0x24a PF: > { %s13_s14 = sadd.s32 1, %s6387_s14   ;;  %s8285_s12 = smov %s6383_s13 }
 0x24b   : > { %p10_p5 = scmp.ge.s32.totalorder %s13_s14, 4   ;;  %s8286_s13 = smov %s8288_s15 }
 0x24d   :  { %12 = sbr.rel (!%p10_p5) target bundleno = 2 (0x2), region = 78 }

</bundles_post_ra>
